<compile_context>
chip_gen: v6e
topology: v6e:2x2x1
jax: 0.10.0
libtpu: 0.0.40
codegen_flags: <defaults>
</compile_context>

<pallas_src>
import functools

import jax
import jax.numpy as jnp
from jax.experimental import pallas as pl
from jax.experimental.pallas import tpu as pltpu


def _vae_kernel(x_ref, eps_ref,
                w1_ref, b1_ref, w2_ref, b2_ref,
                wms_ref, bms_ref,
                wd1_ref, bd1_ref, wd2_ref, bd2_ref,
                xp_ref, mu_ref, logsig_ref, z_ref):
    """One batch tile: full encoder -> reparameterize -> decoder."""
    z_dim = mu_ref.shape[1]

    # ----- encoder (bf16 matmuls, f32 accumulate / bias / ReLU) -----
    x = x_ref[...]                                                     # bf16 [TM, x_dim]
    h = jnp.dot(x, w1_ref[...], preferred_element_type=jnp.float32) + b1_ref[...]
    h = jnp.maximum(h, 0.0)
    # Dropout(p=0.3) -> identity (eval mode)
    h = jnp.dot(h.astype(jnp.bfloat16), w2_ref[...],
                preferred_element_type=jnp.float32) + b2_ref[...]
    h = jnp.maximum(h, 0.0)

    # ----- fused latent heads: one [enc_last, 2*z_dim] matmul -----
    ms = jnp.dot(h.astype(jnp.bfloat16), wms_ref[...],
                 preferred_element_type=jnp.float32) + bms_ref[...]
    mu = ms[:, :z_dim]
    log_sigma = ms[:, z_dim:]

    # ----- reparameterization in f32: Z = mu + exp(log_sigma / 2) * eps -----
    z = mu + jnp.exp(log_sigma * 0.5) * eps_ref[...]

    # ----- decoder -----
    d = jnp.dot(z.astype(jnp.bfloat16), wd1_ref[...],
                preferred_element_type=jnp.float32) + bd1_ref[...]
    d = jnp.maximum(d, 0.0)
    xp = jnp.dot(d.astype(jnp.bfloat16), wd2_ref[...],
                 preferred_element_type=jnp.float32) + bd2_ref[...]
    xp = jnp.maximum(xp, 0.0)

    xp_ref[...] = xp
    mu_ref[...] = mu
    logsig_ref[...] = log_sigma
    z_ref[...] = z


def _tiled_spec(tm, feat):
    # batch-tiled: grid step i owns rows [i*tm, (i+1)*tm)
    return pl.BlockSpec((tm, feat), lambda i: (i, 0))


def _resident_spec(shape):
    # constant index_map -> block never changes -> weights stay VMEM-resident
    return pl.BlockSpec(shape, lambda i: tuple(0 for _ in shape))


@functools.partial(jax.jit, static_argnames=("tm",))
def vae_forward(x, eps, params, tm=128):
    """Fused VAE forward.

    x:   [B, x_dim] float32
    eps: [B, z_dim] float32 (uniform [0,1), matching torch.rand)
    params: dict of weights (bf16, stored [in, out]) and biases (f32, [1, out]).
    Returns (Xp, mu, log_sigma, Z), all float32 of shape [B, .].
    """
    B, x_dim = x.shape
    z_dim = eps.shape[1]

    # Batch tile size: clamp to B, pad B up to a multiple of tm (padded rows
    # are computed then discarded; row-wise independent so this is safe).
    tm = min(tm, B)
    pad = (-B) % tm
    if pad:
        x = jnp.pad(x, ((0, pad), (0, 0)))
        eps = jnp.pad(eps, ((0, pad), (0, 0)))
    Bp = B + pad
    grid = (Bp // tm,)

    # bf16 matmul operands (halves x DMA bytes); eps stays f32 (elementwise).
    x_bf16 = x.astype(jnp.bfloat16)

    # Fuse mu / sigma heads: one N = 2*z_dim matmul.
    wms = jnp.concatenate([params["wmu"], params["wsig"]], axis=1)   # [enc_last, 2*z_dim] bf16
    bms = jnp.concatenate([params["bmu"], params["bsig"]], axis=1)   # [1, 2*z_dim] f32

    weights = (
        params["w1"], params["b1"],
        params["w2"], params["b2"],
        wms, bms,
        params["wd1"], params["bd1"],
        params["wd2"], params["bd2"],
    )

    in_specs = (
        [_tiled_spec(tm, x_dim), _tiled_spec(tm, z_dim)]      # x, eps (batch-tiled)
        + [_resident_spec(w.shape) for w in weights]          # weights/biases (resident)
    )

    out_shapes = (
        jax.ShapeDtypeStruct((Bp, x_dim), jnp.float32),   # Xp
        jax.ShapeDtypeStruct((Bp, z_dim), jnp.float32),   # mu
        jax.ShapeDtypeStruct((Bp, z_dim), jnp.float32),   # log_sigma
        jax.ShapeDtypeStruct((Bp, z_dim), jnp.float32),   # Z
    )
    out_specs = (
        _tiled_spec(tm, x_dim),
        _tiled_spec(tm, z_dim),
        _tiled_spec(tm, z_dim),
        _tiled_spec(tm, z_dim),
    )

    xp, mu, log_sigma, z = pl.pallas_call(
        _vae_kernel,
        grid=grid,
        in_specs=in_specs,
        out_specs=out_specs,
        out_shape=out_shapes,
        compiler_params=pltpu.CompilerParams(
            # batch tiles are independent -> shard across TCs on v7x megacore
            dimension_semantics=("parallel",),
        ),
    )(x_bf16, eps, *weights)

    if pad:
        xp, mu, log_sigma, z = xp[:B], mu[:B], log_sigma[:B], z[:B]
    return xp, mu, log_sigma, z


def init_params(key, x_dim, enc_dims, z_dim, dec_dims):
    """PyTorch-Linear-style init: U(-1/sqrt(fan_in), 1/sqrt(fan_in)).

    Weights stored [in_features, out_features] (transposed vs. torch Linear)
    and cast to bf16 for the MXU; biases stored [1, out_features] in f32.
    """
    params = {}

    def linear(key, fan_in, fan_out):
        kw, kb = jax.random.split(key)
        bound = 1.0 / jnp.sqrt(fan_in)
        w = jax.random.uniform(kw, (fan_in, fan_out), jnp.float32, -bound, bound)
        b = jax.random.uniform(kb, (1, fan_out), jnp.float32, -bound, bound)
        return w.astype(jnp.bfloat16), b

    keys = jax.random.split(key, 6)
    # encoder: x_dim -> enc_dims[0] -> enc_dims[1]
    params["w1"], params["b1"] = linear(keys[0], x_dim, enc_dims[0])
    params["w2"], params["b2"] = linear(keys[1], enc_dims[0], enc_dims[1])
    # latent heads
    params["wmu"], params["bmu"] = linear(keys[2], enc_dims[1], z_dim)
    params["wsig"], params["bsig"] = linear(keys[3], enc_dims[1], z_dim)
    # decoder: z_dim -> dec_dims[0] -> x_dim
    params["wd1"], params["bd1"] = linear(keys[4], z_dim, dec_dims[0])
    params["wd2"], params["bd2"] = linear(keys[5], dec_dims[0], x_dim)
    return params


def _reference_forward(x, eps, p):
    """Plain-JAX reference mirroring the PyTorch module (eval mode), with the
    same bf16 quantization of matmul operands as the kernel."""
    f32 = lambda a: a.astype(jnp.float32)
    b16 = lambda a: a.astype(jnp.bfloat16)
    z_dim = eps.shape[1]

    xb = f32(b16(x))
    h = jnp.maximum(xb @ f32(p["w1"]) + p["b1"], 0.0)
    h = jnp.maximum(f32(b16(h)) @ f32(p["w2"]) + p["b2"], 0.0)
    hq = f32(b16(h))
    mu = hq @ f32(p["wmu"]) + p["bmu"]
    log_sigma = hq @ f32(p["wsig"]) + p["bsig"]
    z = mu + jnp.exp(log_sigma / 2.0) * eps
    d = jnp.maximum(f32(b16(z)) @ f32(p["wd1"]) + p["bd1"], 0.0)
    xp = jnp.maximum(f32(b16(d)) @ f32(p["wd2"]) + p["bd2"], 0.0)
    del z_dim
    return xp, mu, log_sigma, z


if __name__ == "__main__":
    # Small, lane-friendly shapes consistent with the module:
    #   VAE(x_dim=256, z_dim=128, enc_layers='256 128', dec_layers='128')
    # B=256 with TM=128 exercises the batch-tiled grid (2 steps).
    B = 256
    X_DIM = 256
    ENC_DIMS = (256, 128)
    Z_DIM = 128
    DEC_DIMS = (128,)
    TM = 128

    key = jax.random.PRNGKey(0)
    k_params, k_x, k_eps = jax.random.split(key, 3)

    params = init_params(k_params, X_DIM, ENC_DIMS, Z_DIM, DEC_DIMS)
    x = jax.random.normal(k_x, (B, X_DIM), jnp.float32)
    # torch.rand -> uniform [0, 1)
    eps = jax.random.uniform(k_eps, (B, Z_DIM), jnp.float32)

    xp, mu, log_sigma, z = vae_forward(x, eps, params, tm=TM)
    jax.block_until_ready((xp, mu, log_sigma, z))

    # correctness check against plain-JAX reference (same bf16 quantization)
    xp_r, mu_r, ls_r, z_r = _reference_forward(x, eps, params)
    assert jnp.allclose(xp, xp_r, atol=2e-3, rtol=2e-3)
    assert jnp.allclose(mu, mu_r, atol=2e-3, rtol=2e-3)
    assert jnp.allclose(log_sigma, ls_r, atol=2e-3, rtol=2e-3)
    assert jnp.allclose(z, z_r, atol=2e-3, rtol=2e-3)

    print("KERNEL_OK")
</pallas_src>

<mosaic_0001>
module attributes {stable_mosaic.version = 11 : i64} {
  func.func @_vae_kernel(%arg0: i32, %arg1: memref<128x256xbf16, #tpu.memory_space<vmem>>, %arg2: memref<128x128xf32, #tpu.memory_space<vmem>>, %arg3: memref<256x256xbf16, #tpu.memory_space<vmem>>, %arg4: memref<1x256xf32, #tpu.memory_space<vmem>>, %arg5: memref<256x128xbf16, #tpu.memory_space<vmem>>, %arg6: memref<1x128xf32, #tpu.memory_space<vmem>>, %arg7: memref<128x256xbf16, #tpu.memory_space<vmem>>, %arg8: memref<1x256xf32, #tpu.memory_space<vmem>>, %arg9: memref<128x128xbf16, #tpu.memory_space<vmem>>, %arg10: memref<1x128xf32, #tpu.memory_space<vmem>>, %arg11: memref<128x256xbf16, #tpu.memory_space<vmem>>, %arg12: memref<1x256xf32, #tpu.memory_space<vmem>>, %arg13: memref<128x256xf32, #tpu.memory_space<vmem>>, %arg14: memref<128x128xf32, #tpu.memory_space<vmem>>, %arg15: memref<128x128xf32, #tpu.memory_space<vmem>>, %arg16: memref<128x128xf32, #tpu.memory_space<vmem>>) attributes {dimension_semantics = [#tpu.dimension_semantics<parallel>], iteration_bounds = array<i64: 2>, scalar_prefetch = 0 : i64, scratch_operands = 0 : i64, tpu.core_type = #tpu.core_type<tc>, window_params = [{transform_indices = @transform_0, window_bounds = array<i64: 128, 256>}, {transform_indices = @transform_1, window_bounds = array<i64: 128, 128>}, {pipeline_mode = #tpu.pipeline_mode<synchronous>, transform_indices = @transform_2, window_bounds = array<i64: 256, 256>}, {pipeline_mode = #tpu.pipeline_mode<synchronous>, transform_indices = @transform_3, window_bounds = array<i64: 1, 256>}, {pipeline_mode = #tpu.pipeline_mode<synchronous>, transform_indices = @transform_4, window_bounds = array<i64: 256, 128>}, {pipeline_mode = #tpu.pipeline_mode<synchronous>, transform_indices = @transform_5, window_bounds = array<i64: 1, 128>}, {pipeline_mode = #tpu.pipeline_mode<synchronous>, transform_indices = @transform_6, window_bounds = array<i64: 128, 256>}, {pipeline_mode = #tpu.pipeline_mode<synchronous>, transform_indices = @transform_7, window_bounds = array<i64: 1, 256>}, {pipeline_mode = #tpu.pipeline_mode<synchronous>, transform_indices = @transform_8, window_bounds = array<i64: 128, 128>}, {pipeline_mode = #tpu.pipeline_mode<synchronous>, transform_indices = @transform_9, window_bounds = array<i64: 1, 128>}, {pipeline_mode = #tpu.pipeline_mode<synchronous>, transform_indices = @transform_10, window_bounds = array<i64: 128, 256>}, {pipeline_mode = #tpu.pipeline_mode<synchronous>, transform_indices = @transform_11, window_bounds = array<i64: 1, 256>}, {transform_indices = @transform_12, window_bounds = array<i64: 128, 256>}, {transform_indices = @transform_13, window_bounds = array<i64: 128, 128>}, {transform_indices = @transform_14, window_bounds = array<i64: 128, 128>}, {transform_indices = @transform_15, window_bounds = array<i64: 128, 128>}]} {
    %c0 = arith.constant 0 : index
    %c0_0 = arith.constant 0 : index
    %0 = vector.load %arg1[%c0, %c0_0] : memref<128x256xbf16, #tpu.memory_space<vmem>>, vector<128x256xbf16>
    %c0_1 = arith.constant 0 : index
    %c0_2 = arith.constant 0 : index
    %1 = vector.load %arg3[%c0_1, %c0_2] : memref<256x256xbf16, #tpu.memory_space<vmem>>, vector<256x256xbf16>
    %cst = arith.constant dense<0.000000e+00> : vector<128x256xf32>
    %2 = tpu.matmul %0, %1, %cst {dimension_numbers = #tpu.dot_dimension_numbers<[1], [0], [0], [1], [0, 0, 1, 1], [], []>} : vector<128x256xbf16>, vector<256x256xbf16>, vector<128x256xf32> -> vector<128x256xf32>
    %c0_3 = arith.constant 0 : index
    %c0_4 = arith.constant 0 : index
    %3 = vector.load %arg4[%c0_3, %c0_4] : memref<1x256xf32, #tpu.memory_space<vmem>>, vector<1x256xf32>
    %4 = vector.broadcast %3 : vector<1x256xf32> to vector<128x256xf32>
    %5 = arith.addf %2, %4 : vector<128x256xf32>
    %cst_5 = arith.constant 0.000000e+00 : f32
    %6 = vector.broadcast %cst_5 : f32 to vector<128x256xf32>
    %7 = arith.maximumf %5, %6 : vector<128x256xf32>
    %8 = arith.truncf %7 : vector<128x256xf32> to vector<128x256xbf16>
    %c0_6 = arith.constant 0 : index
    %c0_7 = arith.constant 0 : index
    %9 = vector.load %arg5[%c0_6, %c0_7] : memref<256x128xbf16, #tpu.memory_space<vmem>>, vector<256x128xbf16>
    %cst_8 = arith.constant dense<0.000000e+00> : vector<128x128xf32>
    %10 = tpu.matmul %8, %9, %cst_8 {dimension_numbers = #tpu.dot_dimension_numbers<[1], [0], [0], [1], [0, 0, 1, 1], [], []>} : vector<128x256xbf16>, vector<256x128xbf16>, vector<128x128xf32> -> vector<128x128xf32>
    %c0_9 = arith.constant 0 : index
    %c0_10 = arith.constant 0 : index
    %11 = vector.load %arg6[%c0_9, %c0_10] : memref<1x128xf32, #tpu.memory_space<vmem>>, vector<1x128xf32>
    %12 = vector.broadcast %11 : vector<1x128xf32> to vector<128x128xf32>
    %13 = arith.addf %10, %12 : vector<128x128xf32>
    %cst_11 = arith.constant 0.000000e+00 : f32
    %14 = vector.broadcast %cst_11 : f32 to vector<128x128xf32>
    %15 = arith.maximumf %13, %14 : vector<128x128xf32>
    %16 = arith.truncf %15 : vector<128x128xf32> to vector<128x128xbf16>
    %c0_12 = arith.constant 0 : index
    %c0_13 = arith.constant 0 : index
    %17 = vector.load %arg7[%c0_12, %c0_13] : memref<128x256xbf16, #tpu.memory_space<vmem>>, vector<128x256xbf16>
    %cst_14 = arith.constant dense<0.000000e+00> : vector<128x256xf32>
    %18 = tpu.matmul %16, %17, %cst_14 {dimension_numbers = #tpu.dot_dimension_numbers<[1], [0], [0], [1], [0, 0, 1, 1], [], []>} : vector<128x128xbf16>, vector<128x256xbf16>, vector<128x256xf32> -> vector<128x256xf32>
    %c0_15 = arith.constant 0 : index
    %c0_16 = arith.constant 0 : index
    %19 = vector.load %arg8[%c0_15, %c0_16] : memref<1x256xf32, #tpu.memory_space<vmem>>, vector<1x256xf32>
    %20 = vector.broadcast %19 : vector<1x256xf32> to vector<128x256xf32>
    %21 = arith.addf %18, %20 : vector<128x256xf32>
    %22 = vector.extract_strided_slice %21 {offsets = [0, 0], sizes = [128, 128], strides = [1, 1]} : vector<128x256xf32> to vector<128x128xf32>
    %23 = vector.extract_strided_slice %21 {offsets = [0, 128], sizes = [128, 128], strides = [1, 1]} : vector<128x256xf32> to vector<128x128xf32>
    %cst_17 = arith.constant 5.000000e-01 : f32
    %24 = vector.broadcast %cst_17 : f32 to vector<128x128xf32>
    %25 = arith.mulf %23, %24 : vector<128x128xf32>
    %26 = math.exp %25 : vector<128x128xf32>
    %c0_18 = arith.constant 0 : index
    %c0_19 = arith.constant 0 : index
    %27 = vector.load %arg2[%c0_18, %c0_19] : memref<128x128xf32, #tpu.memory_space<vmem>>, vector<128x128xf32>
    %28 = arith.mulf %26, %27 : vector<128x128xf32>
    %29 = arith.addf %22, %28 : vector<128x128xf32>
    %30 = arith.truncf %29 : vector<128x128xf32> to vector<128x128xbf16>
    %c0_20 = arith.constant 0 : index
    %c0_21 = arith.constant 0 : index
    %31 = vector.load %arg9[%c0_20, %c0_21] : memref<128x128xbf16, #tpu.memory_space<vmem>>, vector<128x128xbf16>
    %cst_22 = arith.constant dense<0.000000e+00> : vector<128x128xf32>
    %32 = tpu.matmul %30, %31, %cst_22 {dimension_numbers = #tpu.dot_dimension_numbers<[1], [0], [0], [1], [0, 0, 1, 1], [], []>} : vector<128x128xbf16>, vector<128x128xbf16>, vector<128x128xf32> -> vector<128x128xf32>
    %c0_23 = arith.constant 0 : index
    %c0_24 = arith.constant 0 : index
    %33 = vector.load %arg10[%c0_23, %c0_24] : memref<1x128xf32, #tpu.memory_space<vmem>>, vector<1x128xf32>
    %34 = vector.broadcast %33 : vector<1x128xf32> to vector<128x128xf32>
    %35 = arith.addf %32, %34 : vector<128x128xf32>
    %cst_25 = arith.constant 0.000000e+00 : f32
    %36 = vector.broadcast %cst_25 : f32 to vector<128x128xf32>
    %37 = arith.maximumf %35, %36 : vector<128x128xf32>
    %38 = arith.truncf %37 : vector<128x128xf32> to vector<128x128xbf16>
    %c0_26 = arith.constant 0 : index
    %c0_27 = arith.constant 0 : index
    %39 = vector.load %arg11[%c0_26, %c0_27] : memref<128x256xbf16, #tpu.memory_space<vmem>>, vector<128x256xbf16>
    %cst_28 = arith.constant dense<0.000000e+00> : vector<128x256xf32>
    %40 = tpu.matmul %38, %39, %cst_28 {dimension_numbers = #tpu.dot_dimension_numbers<[1], [0], [0], [1], [0, 0, 1, 1], [], []>} : vector<128x128xbf16>, vector<128x256xbf16>, vector<128x256xf32> -> vector<128x256xf32>
    %c0_29 = arith.constant 0 : index
    %c0_30 = arith.constant 0 : index
    %41 = vector.load %arg12[%c0_29, %c0_30] : memref<1x256xf32, #tpu.memory_space<vmem>>, vector<1x256xf32>
    %42 = vector.broadcast %41 : vector<1x256xf32> to vector<128x256xf32>
    %43 = arith.addf %40, %42 : vector<128x256xf32>
    %cst_31 = arith.constant 0.000000e+00 : f32
    %44 = vector.broadcast %cst_31 : f32 to vector<128x256xf32>
    %45 = arith.maximumf %43, %44 : vector<128x256xf32>
    %c0_32 = arith.constant 0 : index
    %c0_33 = arith.constant 0 : index
    %46 = vector.load %arg13[%c0_32, %c0_33] : memref<128x256xf32, #tpu.memory_space<vmem>>, vector<128x256xf32>
    tpu.vector_store %arg13[%c0_32, %c0_33], %45 {strides = array<i32>} : memref<128x256xf32, #tpu.memory_space<vmem>>, vector<128x256xf32>,
    %c0_34 = arith.constant 0 : index
    %c0_35 = arith.constant 0 : index
    %47 = vector.load %arg14[%c0_34, %c0_35] : memref<128x128xf32, #tpu.memory_space<vmem>>, vector<128x128xf32>
    tpu.vector_store %arg14[%c0_34, %c0_35], %22 {strides = array<i32>} : memref<128x128xf32, #tpu.memory_space<vmem>>, vector<128x128xf32>,
    %c0_36 = arith.constant 0 : index
    %c0_37 = arith.constant 0 : index
    %48 = vector.load %arg15[%c0_36, %c0_37] : memref<128x128xf32, #tpu.memory_space<vmem>>, vector<128x128xf32>
    tpu.vector_store %arg15[%c0_36, %c0_37], %23 {strides = array<i32>} : memref<128x128xf32, #tpu.memory_space<vmem>>, vector<128x128xf32>,
    %c0_38 = arith.constant 0 : index
    %c0_39 = arith.constant 0 : index
    %49 = vector.load %arg16[%c0_38, %c0_39] : memref<128x128xf32, #tpu.memory_space<vmem>>, vector<128x128xf32>
    tpu.vector_store %arg16[%c0_38, %c0_39], %29 {strides = array<i32>} : memref<128x128xf32, #tpu.memory_space<vmem>>, vector<128x128xf32>,
    return
  }
  func.func @transform_0(%arg0: i32) -> (i32, i32) {
    %c0_i32 = arith.constant 0 : i32
    %c0_i32_0 = arith.constant 0 : i32
    return %arg0, %c0_i32 : i32, i32
  }
  func.func @transform_1(%arg0: i32) -> (i32, i32) {
    %c0_i32 = arith.constant 0 : i32
    %c0_i32_0 = arith.constant 0 : i32
    return %arg0, %c0_i32 : i32, i32
  }
  func.func @transform_2(%arg0: i32) -> (i32, i32) {
    %c0_i32 = arith.constant 0 : i32
    %c0_i32_0 = arith.constant 0 : i32
    %c0_i32_1 = arith.constant 0 : i32
    return %c0_i32, %c0_i32_0 : i32, i32
  }
  func.func @transform_3(%arg0: i32) -> (i32, i32) {
    %c0_i32 = arith.constant 0 : i32
    %c0_i32_0 = arith.constant 0 : i32
    %c0_i32_1 = arith.constant 0 : i32
    return %c0_i32, %c0_i32_0 : i32, i32
  }
  func.func @transform_4(%arg0: i32) -> (i32, i32) {
    %c0_i32 = arith.constant 0 : i32
    %c0_i32_0 = arith.constant 0 : i32
    %c0_i32_1 = arith.constant 0 : i32
    return %c0_i32, %c0_i32_0 : i32, i32
  }
  func.func @transform_5(%arg0: i32) -> (i32, i32) {
    %c0_i32 = arith.constant 0 : i32
    %c0_i32_0 = arith.constant 0 : i32
    %c0_i32_1 = arith.constant 0 : i32
    return %c0_i32, %c0_i32_0 : i32, i32
  }
  func.func @transform_6(%arg0: i32) -> (i32, i32) {
    %c0_i32 = arith.constant 0 : i32
    %c0_i32_0 = arith.constant 0 : i32
    %c0_i32_1 = arith.constant 0 : i32
    return %c0_i32, %c0_i32_0 : i32, i32
  }
  func.func @transform_7(%arg0: i32) -> (i32, i32) {
    %c0_i32 = arith.constant 0 : i32
    %c0_i32_0 = arith.constant 0 : i32
    %c0_i32_1 = arith.constant 0 : i32
    return %c0_i32, %c0_i32_0 : i32, i32
  }
  func.func @transform_8(%arg0: i32) -> (i32, i32) {
    %c0_i32 = arith.constant 0 : i32
    %c0_i32_0 = arith.constant 0 : i32
    %c0_i32_1 = arith.constant 0 : i32
    return %c0_i32, %c0_i32_0 : i32, i32
  }
  func.func @transform_9(%arg0: i32) -> (i32, i32) {
    %c0_i32 = arith.constant 0 : i32
    %c0_i32_0 = arith.constant 0 : i32
    %c0_i32_1 = arith.constant 0 : i32
    return %c0_i32, %c0_i32_0 : i32, i32
  }
  func.func @transform_10(%arg0: i32) -> (i32, i32) {
    %c0_i32 = arith.constant 0 : i32
    %c0_i32_0 = arith.constant 0 : i32
    %c0_i32_1 = arith.constant 0 : i32
    return %c0_i32, %c0_i32_0 : i32, i32
  }
  func.func @transform_11(%arg0: i32) -> (i32, i32) {
    %c0_i32 = arith.constant 0 : i32
    %c0_i32_0 = arith.constant 0 : i32
    %c0_i32_1 = arith.constant 0 : i32
    return %c0_i32, %c0_i32_0 : i32, i32
  }
  func.func @transform_12(%arg0: i32) -> (i32, i32) {
    %c0_i32 = arith.constant 0 : i32
    %c0_i32_0 = arith.constant 0 : i32
    return %arg0, %c0_i32 : i32, i32
  }
  func.func @transform_13(%arg0: i32) -> (i32, i32) {
    %c0_i32 = arith.constant 0 : i32
    %c0_i32_0 = arith.constant 0 : i32
    return %arg0, %c0_i32 : i32, i32
  }
  func.func @transform_14(%arg0: i32) -> (i32, i32) {
    %c0_i32 = arith.constant 0 : i32
    %c0_i32_0 = arith.constant 0 : i32
    return %arg0, %c0_i32 : i32, i32
  }
  func.func @transform_15(%arg0: i32) -> (i32, i32) {
    %c0_i32 = arith.constant 0 : i32
    %c0_i32_0 = arith.constant 0 : i32
    return %arg0, %c0_i32 : i32, i32
  }
}

</mosaic_0001>

<bundles_post_ra>
// kernel: vae_forward.1
= control target key start
LH: loop header
LB: loop body
LE: loop exit
PB: predicated region body
PF: predicated region fallthrough
CT: control target
= control target key end

     0   :  { %s3944_s0 = inlined_call_operand.vmem [shape: bf16[256,256], index: 0, kind: input, shape index: {}]   ;;  %s3945_s1 = inlined_call_operand.vmem [shape: f32[256,128], index: 1, kind: input, shape index: {}]   ;;  %s3946_s2 = inlined_call_operand.vmem [shape: bf16[256,256], index: 2, kind: input, shape index: {}]   ;;  %s3947_s3 = inlined_call_operand.vmem [shape: f32[1,256], index: 3, kind: input, shape index: {}]   ;;  %s3948_s4 = inlined_call_operand.vmem [shape: bf16[256,128], index: 4, kind: input, shape index: {}]   ;;  %s3949_s5 = inlined_call_operand.vmem [shape: f32[1,128], index: 5, kind: input, shape index: {}]   ;;  %s3950_s6 = inlined_call_operand.vmem [shape: bf16[128,256], index: 6, kind: input, shape index: {}]   ;;  %s3951_s7 = inlined_call_operand.vmem [shape: f32[1,256], index: 7, kind: input, shape index: {}]   ;;  %s3952_s8 = inlined_call_operand.vmem [shape: bf16[128,128], index: 8, kind: input, shape index: {}]   ;;  %s3953_s9 = inlined_call_operand.vmem [shape: f32[1,128], index: 9, kind: input, shape index: {}]   ;;  %s3954_s10 = inlined_call_operand.vmem [shape: bf16[128,256], index: 10, kind: input, shape index: {}]   ;;  %s3955_s11 = inlined_call_operand.vmem [shape: f32[1,256], index: 11, kind: input, shape index: {}]   ;;  %s3956_s12 = inlined_call_operand.hbm [shape: f32[256,256], index: 12, kind: output, shape index: {0}]   ;;  %s3957_s13 = inlined_call_operand.hbm [shape: f32[256,128], index: 13, kind: output, shape index: {1}]   ;;  %s3958_s14 = inlined_call_operand.hbm [shape: f32[256,128], index: 14, kind: output, shape index: {2}]   ;;  %s3959_s15 = inlined_call_operand.hbm [shape: f32[256,128], index: 15, kind: output, shape index: {3}]  }
   0x1   :  { %3969 = sst [smem:[#allocation18_spill]] %s3944_s0 }
   0x2   :  { %3970 = sst [smem:[#allocation19_spill]] %s3945_s1 }
   0x3   :  { %3971 = sst [smem:[#allocation20_spill]] %s3946_s2 }
   0x4   :  { %3972 = sst [smem:[#allocation21_spill]] %s3947_s3 }
   0x5   :  { %3973 = sst [smem:[#allocation22_spill]] %s3948_s4 }
   0x6   :  { %21 = vsyncpa [#allocation3], 0 }
   0x7   :  { %23 = vsyncpa [#allocation3 + $0x1], 0 }
   0x8   :  { %24 = vsyncpa [#allocation5], 0 }
   0x9   :  { %26 = vsyncpa [#allocation5 + $0x1], 0 }
   0xa   :  { %27 = vsyncpa [#allocation8], 0 }
   0xb   :  { %29 = vsyncpa [#allocation8 + $0x1], 0  ;;  %s3089_s18 = smov 0   ;;  %s3091_s19 = smov 0  }
   0xc   :  { %s3093_s20 = smov 0   ;;  %s3095_s21 = smov 0  }
   0xd LB: > { %3974 = sst [smem:[#allocation12_spill]] %s2986_s18  ;;  %s3110_s22 = sadd.s32 4294967295, %s2998_s21   ;;  %s2998_s21 = sphi %s3095_s21, %s3992_s21   ;;  %s2994_s20 = sphi %s3093_s20, %s3994_s20   ;;  %s2990_s19 = sphi %s3091_s19, %s3996_s19   ;;  %s2986_s18 = sphi %s3089_s18, %s3995_s18  }
   0xe   : > { %3975 = sst [smem:[#allocation13_spill]] %s2994_s20  ;;  %s3960_s23 = sadd.s32 4294967294, %s2998_s21  }
   0xf   : > { %3976 = sst [smem:[#allocation14_spill]] %s2998_s21  ;;  %s3114_s24 = sadd.s32 1, %s2998_s21  }
  0x10   : > { %3977 = sst [smem:[#allocation15_spill]] %s3114_s24  ;;  %s304_s25 = sadd.s32 1, %s2994_s20 }
  0x11   : > { %s301_s26 = ssub.s32 %s2998_s21, %s3114_s24  ;;  %p314_p0 = scmp.ne.s32.totalorder %s2994_s20, %s2990_s19 }
  0x12   : > { %p302_p1 = scmp.eq.s32.totalorder %s301_s26, 0  ;;  %p315_p2 = scmp.eq.s32.totalorder %s3110_s22, 1 }
  0x13   : > { %p320_p3 = scmp.ne.s32.totalorder %s2990_s19, %s2986_s18  ;;  %p321_p4 = scmp.eq.s32.totalorder %s3960_s23, 1 }
  0x14   : > { %s3127_s27 = scalar_select %p302_p1, %s2994_s20, %s304_s25  }
  0x15   : > { %p3129_p5 = por %p315_p2, %p314_p0  ;;  %p3133_p6 = por %p321_p4, %p320_p3 }
  0x16   : > { %3978 = sst [smem:[#allocation16_spill]] %s3127_s27  ;;  %p2368_p7 = scmp.ge.s32.totalorder %s2998_s21, 1 }
  0x17   : > { %s3980_s29 = scalar_select %p3133_p6, 1, 0 }
  0x18   : > { %p466_p8 = scmp.lt.s32.totalorder %s2998_s21, 3 }
  0x19   : > { %3981 = sst [smem:[#allocation17_spill]] %s3980_s29 }
  0x1a   : > { %p467_p9 = pnand %p2368_p7, %p466_p8 }
  0x1b   : > { %s3982_s2 = sld [smem:[#allocation20_spill]] (!%p467_p9)  ;;  %s2373_s30 = sshll.u32 (!%p467_p9), %s3110_s22, 4 }
  0x1c   : > { %470 = sbr.rel (%p467_p9) target bundleno = 1222 (0x4c6), region = 68  ;;  %p536_p10 = scmp.lt.s32.totalorder (!%p467_p9), %s2373_s30, 31 }
  0x1d   : > { %s3983_s0 = sld [smem:[#allocation18_spill]] (!%p467_p9)  ;;  %s2125_s26 = sand.u32 (!%p467_p9), 1, %s3110_s22  }
  0x1e   : > { %s3984_s4 = sld [smem:[#allocation22_spill]] (!%p467_p9)  ;;  %s3714_s16 = sshll.u32 (!%p467_p9), %s3110_s22, 11 }
  0x1f   : > { %s3985_s3 = sld [smem:[#allocation21_spill]] (!%p467_p9)  ;;  %s3720_s17 = scalar_lea.hbm (!%p467_p9), %s3957_s13, %s3714_s16 }
  0x20   : > { %s3987_s1 = sld [smem:[#allocation19_spill]] (!%p467_p9)  ;;  %s3725_s20 = scalar_lea.sflag (!%p467_p9), [#allocation5], %s2125_s26 }
  0x21   : > { %v2676_v0 = vld [vmem:[%s3982_s2 + $0x74] ss:$8 sps:$4 sm:$0xff]   ;;  %v2678_v1 = vld [vmem:[%s3982_s2 + $0x70] ss:$8 sps:$4 sm:$0xff]   ;;  %v2679_v2 = vld [vmem:[%s3982_s2 + $0x64] ss:$8 sps:$4 sm:$0xff]  }
  0x22   : > { %853 = vmatprep.subr.bf16.mxu0 %v2676_v0  ;;  %v2681_v3 = vld [vmem:[%s3982_s2 + $0x60] ss:$8 sps:$4 sm:$0xff]   ;;  %v2682_v4 = vld [vmem:[%s3982_s2 + $0x54] ss:$8 sps:$4 sm:$0xff]   ;;  %v2684_v5 = vld [vmem:[%s3982_s2 + $0x50] ss:$8 sps:$4 sm:$0xff]  }
  0x23   : > { %854 = vmatpush1.bf16.msra.mxu0 %v2678_v1  ;;  %v2685_v6 = vld [vmem:[%s3982_s2 + $0x44] ss:$8 sps:$4 sm:$0xff]   ;;  %v2687_v7 = vld [vmem:[%s3982_s2 + $0x40] ss:$8 sps:$4 sm:$0xff]   ;;  %v2688_v8 = vld [vmem:[%s3982_s2 + $0x34] ss:$8 sps:$4 sm:$0xff]   ;;  %v603_v1 = vlaneseq }
  0x24   : > { %855 = vmatprep.subr.bf16.mxu0 %v2679_v2  ;;  %s3998_s30 = smov (!%p536_p10, %s2373_s30), 31  ;;  %v2690_v9 = vld [vmem:[%s3982_s2 + $0x30] ss:$8 sps:$4 sm:$0xff]   ;;  %v2691_v10 = vld [vmem:[%s3982_s2 + $0x24] ss:$8 sps:$4 sm:$0xff]  }
  0x25   : > { %s3966_s23 = sshll.u32 %s3998_s30, 3  ;;  %v2693_v11 = vld [vmem:[%s3982_s2 + $0x20] ss:$8 sps:$4 sm:$0xff]   ;;  %v2694_v12 = vld [vmem:[%s3982_s2 + $0x14] ss:$8 sps:$4 sm:$0xff]   ;;  %v604_v2 = vshrl.u32 %v603_v1, 7 }
  0x26   : > { %s3184_s18 = scalar_lea.vmem %s3983_s0, %s3966_s23  ;;  %v2696_v14 = vld [vmem:[%s3982_s2 + $0x10] ss:$8 sps:$4 sm:$0xff]   ;;  %v2697_v15 = vld [vmem:[%s3982_s2 + $0x4] ss:$8 sps:$4 sm:$0xff]   ;;  %v2699_v16 = vld [vmem:[%s3982_s2] ss:$8 sps:$4 sm:$0xff]  }
  0x27   : > { %856 = vmatpush1.bf16.msra.mxu0 %v2681_v3  ;;  %v2726_v13 = vld [vmem:[%s3184_s18 + $0x4] ss:$8 sps:$4 sm:$0xff]   ;;  %v2700_v17 = vld [vmem:[%s3982_s2 + $0xf4] ss:$8 sps:$4 sm:$0xff]   ;;  %v2702_v18 = vld [vmem:[%s3982_s2 + $0xf0] ss:$8 sps:$4 sm:$0xff]  }
  0x28   : > { %857 = vmatprep.subr.bf16.mxu0 %v2682_v4  ;;  %885 = vmatprep.mubr.bf16.mxu0 %v2726_v13  ;;  %v2703_v19 = vld [vmem:[%s3982_s2 + $0xe4] ss:$8 sps:$4 sm:$0xff]   ;;  %v2748_v20 = vld [vmem:[%s3984_s4 + $0x78] sm:$0xff]   ;;  %v2705_v21 = vld [vmem:[%s3982_s2 + $0xe0] ss:$8 sps:$4 sm:$0xff]   ;;  %v3313_v3 = vsub.s32 1, %v604_v2 }
  0x29   : > { %v2749_v22 = vld [vmem:[%s3984_s4 + $0x38] sm:$0xff]   ;;  %2505 = vmatprep.subr.bf16.mxu1 %v2748_v20  ;;  %v2750_v24 = vld [vmem:[%s3984_s4 + $0x70] sm:$0xff]   ;;  %v2752_v26 = vld [vmem:[%s3984_s4 + $0x68] sm:$0xff]   ;;  %v3315_v4 = vsub.s32 0, %v604_v2  ;;  %s3986_s21 = sshll.u32 %s3998_s30, 3 }
  0x2a   : > { %v2706_v23 = vld [vmem:[%s3982_s2 + $0xd4] ss:$8 sps:$4 sm:$0xff]   ;;  %2506 = vmatpush3.bf16.msra.mxu1 %v2749_v22  ;;  %v2708_v27 = vld [vmem:[%s3982_s2 + $0xd0] ss:$8 sps:$4 sm:$0xff]   ;;  %v2709_v28 = vld [vmem:[%s3982_s2 + $0xc4] ss:$8 sps:$4 sm:$0xff]   ;;  %s3549_s23 = scalar_lea.vmem %s3987_s1, %s3986_s21 }
  0x2b   : > { %858 = vmatpush1.bf16.msra.mxu0 %v2684_v5  ;;  %v2751_v25 = vld [vmem:[%s3984_s4 + $0x30] sm:$0xff]   ;;  %2507 = vmatprep.subr.bf16.mxu1 %v2750_v24  ;;  %v2753_v29 = vld [vmem:[%s3984_s4 + $0x28] sm:$0xff]   ;;  %v2754_v30 = vld [vmem:[%s3984_s4 + $0x60] sm:$0xff]   ;;  %s3001_s21 = smov [#allocation4]  }
  0x2c   : > { %859 = vmatprep.subr.bf16.mxu0 %v2685_v6  ;;  %v2711_v31 = vld [vmem:[%s3982_s2 + $0xc0] ss:$8 sps:$4 sm:$0xff]   ;;  %v2712_v33 = vld [vmem:[%s3982_s2 + $0xb4] ss:$8 sps:$4 sm:$0xff]   ;;  %v2714_v35 = vld [vmem:[%s3982_s2 + $0xb0] ss:$8 sps:$4 sm:$0xff]  }
  0x2d   : > { %v2755_v32 = vld [vmem:[%s3984_s4 + $0x20] sm:$0xff]   ;;  %v2756_v34 = vld [vmem:[%s3984_s4 + $0x58] sm:$0xff]   ;;  %v2758_v58 = vld [vmem:[%s3984_s4 + $0x50] sm:$0xff]   ;;  %s2856_s1 = sshll.u32 %s3001_s21, 4  ;;  %s2857_s1 = int_to_ptr.vmem [resolvable:$false] %s2856_s1 }
  0x2e   : > { %2508 = vmatpush3.bf16.msra.mxu1 %v2751_v25  ;;  %v2757_v36 = vld [vmem:[%s3984_s4 + $0x18] sm:$0xff]   ;;  %v2715_v37 = vld [vmem:[%s3982_s2 + $0xa4] ss:$8 sps:$4 sm:$0xff]   ;;  %v2717_v38 = vld [vmem:[%s3982_s2 + $0xa0] ss:$8 sps:$4 sm:$0xff]  }
  0x2f   : > { %860 = vmatpush1.bf16.msra.mxu0 %v2687_v7  ;;  %2509 = vmatprep.subr.bf16.mxu1 %v2752_v26  ;;  %v2718_v39 = vld [vmem:[%s3982_s2 + $0x94] ss:$8 sps:$4 sm:$0xff]   ;;  %v2720_v40 = vld [vmem:[%s3982_s2 + $0x90] ss:$8 sps:$4 sm:$0xff]   ;;  %v2721_v41 = vld [vmem:[%s3982_s2 + $0x84] ss:$8 sps:$4 sm:$0xff]  }
  0x30   : > { %861 = vmatprep.subr.bf16.mxu0 %v2688_v8  ;;  %v2723_v42 = vld [vmem:[%s3982_s2 + $0x80] ss:$8 sps:$4 sm:$0xff]   ;;  %v2727_v44 = vld [vmem:[%s3184_s18 + $0x14] ss:$8 sps:$4 sm:$0xff]   ;;  %v2729_v45 = vld [vmem:[%s3184_s18 + $0x10] ss:$8 sps:$4 sm:$0xff]  }
  0x31   : > { %v2724_v43 = vld [vmem:[%s3184_s18] ss:$8 sps:$4 sm:$0xff]   ;;  %v2730_v46 = vld [vmem:[%s3184_s18 + $0x24] ss:$8 sps:$4 sm:$0xff]   ;;  %v2733_v48 = vld [vmem:[%s3184_s18 + $0x34] ss:$8 sps:$4 sm:$0xff]  }
  0x32   : > { %2510 = vmatpush3.bf16.msra.mxu1 %v2753_v29  ;;  %v2732_v47 = vld [vmem:[%s3184_s18 + $0x20] ss:$8 sps:$4 sm:$0xff]   ;;  %v2735_v49 = vld [vmem:[%s3184_s18 + $0x30] ss:$8 sps:$4 sm:$0xff]   ;;  %v2736_v50 = vld [vmem:[%s3184_s18 + $0x44] ss:$8 sps:$4 sm:$0xff]  }
  0x33   : > { %862 = vmatpush1.bf16.msra.mxu0 %v2690_v9  ;;  %2511 = vmatprep.subr.bf16.mxu1 %v2754_v30  ;;  %v2738_v51 = vld [vmem:[%s3184_s18 + $0x40] ss:$8 sps:$4 sm:$0xff]   ;;  %v2739_v52 = vld [vmem:[%s3184_s18 + $0x54] ss:$8 sps:$4 sm:$0xff]   ;;  %v2741_v53 = vld [vmem:[%s3184_s18 + $0x50] ss:$8 sps:$4 sm:$0xff]  }
  0x34   : > { %863 = vmatprep.subr.bf16.mxu0 %v2691_v10  ;;  %v2742_v54 = vld [vmem:[%s3184_s18 + $0x64] ss:$8 sps:$4 sm:$0xff]   ;;  %v2744_v55 = vld [vmem:[%s3184_s18 + $0x60] ss:$8 sps:$4 sm:$0xff]   ;;  %v2745_v56 = vld [vmem:[%s3184_s18 + $0x74] ss:$8 sps:$4 sm:$0xff]  }
  0x35   : > { %v2747_v57 = vld [vmem:[%s3184_s18 + $0x70] ss:$8 sps:$4 sm:$0xff]   ;;  %v2760_v60 = vld [vmem:[%s3984_s4 + $0x48] sm:$0xff]   ;;  %v2762_v62 = vld [vmem:[%s3984_s4 + $0x40] sm:$0xff]   ;;  %s3500_s18 = sand.u32 1, %s2990_s19   ;;  %s2858_s2 = scalar_lea.vmem %s2857_s1, 4096 }
  0x36   : > { %2512 = vmatpush3.bf16.msra.mxu1 %v2755_v32  ;;  %v2759_v59 = vld [vmem:[%s3984_s4 + $0x10] sm:$0xff]   ;;  %v2761_v61 = vld [vmem:[%s3984_s4 + $0x8] sm:$0xff]   ;;  %v2763_v63 = vld [vmem:[%s3984_s4] sm:$0xff]   ;;  %s3506_s27 = sshll.u32 %s3500_s18, 7 }
  0x37   : > { %864 = vmatpush1.bf16.msra.mxu0 %v2693_v11  ;;  %2513 = vmatprep.subr.bf16.mxu1 %v2756_v34  ;;  %v2766_v0 = vld [vmem:[%s3950_s6 + $0x74] ss:$8 sps:$4 sm:$0xff]   ;;  %v601_v5 = vld [vmem:[%s3985_s3] sm:$0x3]  ;;  %v2769_v26 = vld [vmem:[%s3950_s6 + $0x64] ss:$8 sps:$4 sm:$0xff]  }
  0x38   : > { %865 = vmatprep.subr.bf16.mxu0 %v2694_v12  ;;  %v3321_v7 = vrot.slane %v601_v5, %v3313_v3  ;;  %v3324_v8 = vrot.slane %v601_v5, %v3315_v4  ;;  %v2767_v32 = vld [vmem:[%s3950_s6 + $0x60] ss:$8 sps:$4 sm:$0xff]   ;;  %s3516_s24 = scalar_lea.vmem [#allocation4], %s3506_s27  ;;  %s3521_s29 = scalar_lea.vmem [#allocation6], %s3506_s27 }
  0x39   : > { %s3575_s30 = scalar_lea.vmem [#allocation7], %s3506_s27  ;;  %s2166_s25 = sshll.u32 %s3516_s24, 4  ;;  %s3723_s25 = int_to_ptr.vmem [resolvable:$true] %s2166_s25 }
  0x3a   : > { %2514 = vmatpush3.bf16.msra.mxu1 %v2757_v36  ;;  %s2852_s27 = scalar_lea.vmem %s3723_s25, 2048  ;;  %p2859_p0 = scmp.lt.s32.totalorder %s3723_s25, %s2857_s1 }
  0x3b   : > { %866 = vmatpush1.bf16.msra.mxu0 %v2696_v14  ;;  %2515 = vmatprep.subr.bf16.mxu1 %v2758_v58  ;;  %p2853_p11 = scmp.ne.s32.totalorder %s3723_s25, %s2852_s27  ;;  %p2860_p1 = scmp.lt.s32.totalorder %s2858_s2, %s2852_s27 }
  0x3c   : > { %867 = vmatprep.subr.bf16.mxu0 %v2697_v15 }
  0x3d   : > { %p2854_p12 = pnand %p2853_p11, %p3129_p5  ;;  %p2861_p2 = por %p2860_p1, %p2859_p0 }
  0x3e   : > { %2516 = vmatpush3.bf16.msra.mxu1 %v2759_v59  ;;  %v2776_v59 = vld [vmem:[%s3950_s6 + $0x30] ss:$8 sps:$4 sm:$0xff]  }
  0x3f   : > { %868 = vmatpush1.bf16.msra.mxu0 %v2699_v16  ;;  %2517 = vmatprep.subr.bf16.mxu1 %v2760_v60  ;;  %p2855_p13 = pneg %p2854_p12 }
  0x40   : > { %869 = vmatprep.subr.bf16.mxu0 %v2700_v17 }
  0x41   : > { %p2862_p3 = pnand %p2861_p2, %p2855_p13 }
  0x42   : > { %2518 = vmatpush3.bf16.msra.mxu1 %v2761_v61 }
  0x43   : > { %870 = vmatpush2.bf16.msra.mxu0 %v2702_v18  ;;  %2519 = vmatprep.subr.bf16.mxu1 %v2762_v62  ;;  %v2781_v62 = vld [vmem:[%s3950_s6 + $0x24] ss:$8 sps:$4 sm:$0xff]  }
  0x44   : > { %871 = vmatprep.subr.bf16.mxu0 %v2703_v19 }
  0x46   : > { %2520 = vmatpush3.bf16.msra.mxu1 %v2763_v63 }
  0x47   : > { %872 = vmatpush2.bf16.msra.mxu0 %v2705_v21  ;;  %1378 = vmatprep.subr.bf16.mxu1 %v2766_v0 }
  0x48   : > { %873 = vmatprep.subr.bf16.mxu0 %v2706_v23  ;;  %v2764_v23 = vld [vmem:[%s3950_s6 + $0x70] ss:$8 sps:$4 sm:$0xff]  }
  0x4b   : > { %874 = vmatpush2.bf16.msra.mxu0 %v2708_v27 }
  0x4c   : > { %875 = vmatprep.subr.bf16.mxu0 %v2709_v28 }
  0x4f   : > { %876 = vmatpush2.bf16.msra.mxu0 %v2711_v31 }
  0x50   : > { %877 = vmatprep.subr.bf16.mxu0 %v2712_v33 }
  0x53   : > { %878 = vmatpush2.bf16.msra.mxu0 %v2714_v35  ;;  %v2772_v35 = vld [vmem:[%s3950_s6 + $0x54] ss:$8 sps:$4 sm:$0xff]  }
  0x54   : > { %879 = vmatprep.subr.bf16.mxu0 %v2715_v37 }
  0x57   : > { %880 = vmatpush2.bf16.msra.mxu0 %v2717_v38 }
  0x58   : > { %881 = vmatprep.subr.bf16.mxu0 %v2718_v39 }
  0x5b   : > { %882 = vmatpush2.bf16.msra.mxu0 %v2720_v40 }
  0x5c   : > { %883 = vmatprep.subr.bf16.mxu0 %v2721_v41  ;;  %v2770_v41 = vld [vmem:[%s3950_s6 + $0x50] ss:$8 sps:$4 sm:$0xff]  }
  0x5f   : > { %884 = vmatpush2.bf16.msra.mxu0 %v2723_v42 }
  0x62   : > { %886 = vmatmul.mubr.bf16.vlgmr.msra.gmra.mxu0 %v2724_v43 }
  0x63   : > { %895 = vmatprep.mubr.bf16.mxu0 %v2727_v44  ;;  %v2775_v44 = vld [vmem:[%s3950_s6 + $0x44] ss:$8 sps:$4 sm:$0xff]  }
  0x6a   : > { %896 = vmatmul.mubr.bf16.gmra.mxu0 %v2729_v45 }
  0x6b   : > { %905 = vmatprep.mubr.bf16.mxu0 %v2730_v46 }
  0x72   : > { %906 = vmatmul.mubr.bf16.gmra.mxu0 %v2732_v47 }
  0x73   : > { %915 = vmatprep.mubr.bf16.mxu0 %v2733_v48 }
  0x7a   : > { %916 = vmatmul.mubr.bf16.gmra.mxu0 %v2735_v49 }
  0x7b   : > { %925 = vmatprep.mubr.bf16.mxu0 %v2736_v50  ;;  %v2773_v50 = vld [vmem:[%s3950_s6 + $0x40] ss:$8 sps:$4 sm:$0xff]  }
  0x82   : > { %926 = vmatmul.mubr.bf16.gmra.mxu0 %v2738_v51 }
  0x83   : > { %935 = vmatprep.mubr.bf16.mxu0 %v2739_v52 }
  0x8a   : > { %936 = vmatmul.mubr.bf16.gmra.mxu0 %v2741_v53  ;;  %v2778_v53 = vld [vmem:[%s3950_s6 + $0x34] ss:$8 sps:$4 sm:$0xff]  }
  0x8b   : > { %945 = vmatprep.mubr.bf16.mxu0 %v2742_v54 }
  0x92   : > { %946 = vmatmul.mubr.bf16.gmra.mxu0 %v2744_v55 }
  0x93   : > { %955 = vmatprep.mubr.bf16.mxu0 %v2745_v56 }
  0x9a   : > { %956 = vmatmul.mubr.bf16.gmra.mxu0 %v2747_v57 }
 0x122   : > { %v887_v6 = vpop.f32.mrf.mxu0 }
 0x123   : > { %v888_v13 = vadd.f32 %v887_v6, %v3324_v8  ;;  %v2779_v6 = vld [vmem:[%s3950_s6 + $0x20] ss:$8 sps:$4 sm:$0xff]  }
 0x124   : > { %v889_v9 = vpop.f32.mrf.mxu0 }
 0x125   : > { %v890_v11 = vadd.f32 %v889_v9, %v3321_v7  ;;  %v966_v20 = vmax.f32 %v888_v13, 0.0 }
 0x126   : > { %v891_v10 = vpop.f32.mrf.mxu0 }
 0x127   : > { %v892_v12 = vadd.f32 %v891_v10, %v3324_v8  ;;  %v967_v18 = vmax.f32 %v890_v11, 0.0  ;;  %v2784_v11 = vld [vmem:[%s3950_s6 + $0x14] ss:$8 sps:$4 sm:$0xff]  }
 0x128   : > { %v893_v14 = vpop.f32.mrf.mxu0 }
 0x129   : > { %v894_v15 = vadd.f32 %v893_v14, %v3321_v7  ;;  %v968_v16 = vmax.f32 %v892_v12, 0.0 }
 0x12a   : > { %v897_v17 = vpop.f32.mrf.mxu0 }
 0x12b   : > { %v969_v19 = vmax.f32 %v894_v15, 0.0  ;;  %v998_v24 = vpack.c.bf16 %v968_v16, %v966_v20  ;;  %v898_v29 = vadd.f32 %v897_v17, %v3324_v8  ;;  %v2782_v17 = vld [vmem:[%s3950_s6 + $0x10] ss:$8 sps:$4 sm:$0xff]  }
 0x12c   : > { %v899_v21 = vpop.f32.mrf.mxu0 }
 0x12d   : > { %v999_v22 = vpack.c.bf16 %v969_v19, %v967_v18  ;;  %v900_v27 = vadd.f32 %v899_v21, %v3321_v7  ;;  %v970_v38 = vmax.f32 %v898_v29, 0.0 }
 0x12e   : > { %v901_v25 = vpop.f32.mrf.mxu0 }
 0x12f   : > { %v902_v28 = vadd.f32 %v901_v25, %v3324_v8  ;;  %1181 = vmatprep.mubr.bf16.mxu1 %v999_v22  ;;  %v971_v36 = vmax.f32 %v900_v27, 0.0 }
 0x130   : > { %v903_v30 = vpop.f32.mrf.mxu0  ;;  %1182 = vmatmul.mubr.bf16.vlgmr.msra.gmra.mxu1 %v998_v24 }
 0x131   : > { %v904_v31 = vadd.f32 %v903_v30, %v3321_v7  ;;  %1379 = vmatpush1.bf16.msra.mxu1 %v2764_v23  ;;  %v972_v33 = vmax.f32 %v902_v28, 0.0 }
 0x132   : > { %v907_v34 = vpop.f32.mrf.mxu0  ;;  %1380 = vmatprep.subr.bf16.mxu1 %v2769_v26 }
 0x133   : > { %v973_v37 = vmax.f32 %v904_v31, 0.0  ;;  %v1000_v42 = vpack.c.bf16 %v972_v33, %v970_v38  ;;  %v908_v47 = vadd.f32 %v907_v34, %v3324_v8 }
 0x134   : > { %v909_v39 = vpop.f32.mrf.mxu0 }
 0x135   : > { %v1001_v40 = vpack.c.bf16 %v973_v37, %v971_v36  ;;  %1381 = vmatpush1.bf16.msra.mxu1 %v2767_v32  ;;  %v910_v45 = vadd.f32 %v909_v39, %v3321_v7  ;;  %v974_v56 = vmax.f32 %v908_v47, 0.0 }
 0x136   : > { %v911_v43 = vpop.f32.mrf.mxu0  ;;  %1382 = vmatprep.subr.bf16.mxu1 %v2772_v35 }
 0x137   : > { %v912_v46 = vadd.f32 %v911_v43, %v3324_v8  ;;  %1189 = vmatprep.mubr.bf16.mxu1 %v1001_v40  ;;  %v975_v54 = vmax.f32 %v910_v45, 0.0 }
 0x138   : > { %v913_v48 = vpop.f32.mrf.mxu0  ;;  %1190 = vmatmul.mubr.bf16.gmra.mxu1 %v1000_v42 }
 0x139   : > { %v914_v49 = vadd.f32 %v913_v48, %v3321_v7  ;;  %1383 = vmatpush1.bf16.msra.mxu1 %v2770_v41  ;;  %v976_v51 = vmax.f32 %v912_v46, 0.0 }
 0x13a   : > { %v917_v52 = vpop.f32.mrf.mxu0  ;;  %1384 = vmatprep.subr.bf16.mxu1 %v2775_v44 }
 0x13b   : > { %v977_v55 = vmax.f32 %v914_v49, 0.0  ;;  %v1002_v60 = vpack.c.bf16 %v976_v51, %v974_v56  ;;  %v918_v1 = vadd.f32 %v917_v52, %v3324_v8 }
 0x13c   : > { %v919_v57 = vpop.f32.mrf.mxu0 }
 0x13d   : > { %v1003_v58 = vpack.c.bf16 %v977_v55, %v975_v54  ;;  %1385 = vmatpush1.bf16.msra.mxu1 %v2773_v50  ;;  %v920_v63 = vadd.f32 %v919_v57, %v3321_v7  ;;  %v978_v14 = vmax.f32 %v918_v1, 0.0 }
 0x13e   : > { %v921_v61 = vpop.f32.mrf.mxu0  ;;  %1386 = vmatprep.subr.bf16.mxu1 %v2778_v53 }
 0x13f   : > { %v922_v0 = vadd.f32 %v921_v61, %v3324_v8  ;;  %1197 = vmatprep.mubr.bf16.mxu1 %v1003_v58  ;;  %v979_v12 = vmax.f32 %v920_v63, 0.0 }
 0x140   : > { %v923_v2 = vpop.f32.mrf.mxu0  ;;  %1198 = vmatmul.mubr.bf16.gmra.mxu1 %v1002_v60 }
 0x141   : > { %v924_v5 = vadd.f32 %v923_v2, %v3321_v7  ;;  %1387 = vmatpush1.bf16.msra.mxu1 %v2776_v59  ;;  %v980_v9 = vmax.f32 %v922_v0, 0.0 }
 0x142   : > { %v927_v10 = vpop.f32.mrf.mxu0  ;;  %1388 = vmatprep.subr.bf16.mxu1 %v2781_v62 }
 0x143   : > { %v981_v13 = vmax.f32 %v924_v5, 0.0  ;;  %v1004_v18 = vpack.c.bf16 %v980_v9, %v978_v14  ;;  %v928_v22 = vadd.f32 %v927_v10, %v3324_v8  ;;  %v3000_v14 = vmov 0  }
 0x144   : > { %v929_v15 = vpop.f32.mrf.mxu0  ;;  %1927 = vmatprep.mubr.bf16.mxu0 %v3000_v14 }
 0x145   : > { %v1005_v16 = vpack.c.bf16 %v981_v13, %v979_v12  ;;  %1389 = vmatpush1.bf16.msra.mxu1 %v2779_v6  ;;  %v930_v20 = vadd.f32 %v929_v15, %v3321_v7  ;;  %v982_v29 = vmax.f32 %v928_v22, 0.0  ;;  %v2787_v13 = vld [vmem:[%s3950_s6 + $0x4] ss:$8 sps:$4 sm:$0xff]  }
 0x146   : > { %v931_v19 = vpop.f32.mrf.mxu0  ;;  %1390 = vmatprep.subr.bf16.mxu1 %v2784_v11 }
 0x147   : > { %v932_v21 = vadd.f32 %v931_v19, %v3324_v8  ;;  %1205 = vmatprep.mubr.bf16.mxu1 %v1005_v16  ;;  %v983_v27 = vmax.f32 %v930_v20, 0.0 }
 0x148   : > { %v933_v23 = vpop.f32.mrf.mxu0  ;;  %1206 = vmatmul.mubr.bf16.gmra.mxu1 %v1004_v18  ;;  %v3411_v18 = vld [vmem:[%s3949_s5] ss:$0 sm:$0xff] }
 0x149   : > { %v934_v24 = vadd.f32 %v933_v23, %v3321_v7  ;;  %1391 = vmatpush1.bf16.msra.mxu1 %v2782_v17  ;;  %v984_v25 = vmax.f32 %v932_v21, 0.0 }
 0x14a   : > { %v937_v26 = vpop.f32.mrf.mxu0  ;;  %1392 = vmatprep.subr.bf16.mxu1 %v2787_v13 }
 0x14b   : > { %v985_v28 = vmax.f32 %v934_v24, 0.0  ;;  %v1006_v32 = vpack.c.bf16 %v984_v25, %v982_v29  ;;  %v938_v36 = vadd.f32 %v937_v26, %v3324_v8 }
 0x14c   : > { %v939_v30 = vpop.f32.mrf.mxu0 }
 0x14d   : > { %v1007_v31 = vpack.c.bf16 %v985_v28, %v983_v27  ;;  %v940_v34 = vadd.f32 %v939_v30, %v3321_v7  ;;  %v986_v43 = vmax.f32 %v938_v36, 0.0 }
 0x14e   : > { %v941_v33 = vpop.f32.mrf.mxu0 }
 0x14f   : > { %v942_v35 = vadd.f32 %v941_v33, %v3324_v8  ;;  %1213 = vmatprep.mubr.bf16.mxu1 %v1007_v31  ;;  %v987_v41 = vmax.f32 %v940_v34, 0.0  ;;  %v2789_v31 = vld [vmem:[%s3952_s8 + $0x30] sm:$0xff]  }
 0x150   : > { %v943_v37 = vpop.f32.mrf.mxu0  ;;  %1214 = vmatmul.mubr.bf16.gmra.mxu1 %v1006_v32 }
 0x151   : > { %v944_v38 = vadd.f32 %v943_v37, %v3321_v7  ;;  %v988_v39 = vmax.f32 %v942_v35, 0.0  ;;  %v2790_v37 = vld [vmem:[%s3952_s8 + $0x28] sm:$0xff]  }
 0x152   : > { %v947_v40 = vpop.f32.mrf.mxu0 }
 0x153   : > { %v989_v42 = vmax.f32 %v944_v38, 0.0  ;;  %v1008_v46 = vpack.c.bf16 %v988_v39, %v986_v43  ;;  %v948_v50 = vadd.f32 %v947_v40, %v3324_v8 }
 0x154   : > { %v949_v44 = vpop.f32.mrf.mxu0 }
 0x155   : > { %v1009_v45 = vpack.c.bf16 %v989_v42, %v987_v41  ;;  %v950_v48 = vadd.f32 %v949_v44, %v3321_v7  ;;  %v990_v57 = vmax.f32 %v948_v50, 0.0 }
 0x156   : > { %v951_v47 = vpop.f32.mrf.mxu0 }
 0x157   : > { %v952_v49 = vadd.f32 %v951_v47, %v3324_v8  ;;  %1221 = vmatprep.mubr.bf16.mxu1 %v1009_v45  ;;  %v991_v55 = vmax.f32 %v950_v48, 0.0 }
 0x158   : > { %v953_v51 = vpop.f32.mrf.mxu0  ;;  %1222 = vmatmul.mubr.bf16.gmra.mxu1 %v1008_v46 }
 0x159   : > { %v954_v52 = vadd.f32 %v953_v51, %v3321_v7  ;;  %v992_v53 = vmax.f32 %v952_v49, 0.0 }
 0x15a   : > { %v957_v54 = vpop.f32.mrf.mxu0 }
 0x15b   : > { %v993_v56 = vmax.f32 %v954_v52, 0.0  ;;  %v1010_v60 = vpack.c.bf16 %v992_v53, %v990_v57  ;;  %v958_v0 = vadd.f32 %v957_v54, %v3324_v8 }
 0x15c   : > { %v959_v58 = vpop.f32.mrf.mxu0 }
 0x15d   : > { %v1011_v59 = vpack.c.bf16 %v993_v56, %v991_v55  ;;  %v960_v62 = vadd.f32 %v959_v58, %v3321_v7  ;;  %v994_v10 = vmax.f32 %v958_v0, 0.0 }
 0x15e   : > { %v961_v61 = vpop.f32.mrf.mxu0 }
 0x15f   : > { %v962_v63 = vadd.f32 %v961_v61, %v3324_v8  ;;  %1229 = vmatprep.mubr.bf16.mxu1 %v1011_v59  ;;  %v995_v6 = vmax.f32 %v960_v62, 0.0  ;;  %v2785_v8 = vld [vmem:[%s3950_s6] ss:$8 sps:$4 sm:$0xff]  }
 0x160   : > { %v963_v1 = vpop.f32.mrf.mxu0  ;;  %1230 = vmatmul.mubr.bf16.gmra.mxu1 %v1010_v60 }
 0x161   : > { %v964_v2 = vadd.f32 %v963_v1, %v3321_v7  ;;  %v996_v5 = vmax.f32 %v962_v63, 0.0  ;;  %1393 = vmatpush1.bf16.msra.mxu1 %v2785_v8  ;;  %v2788_v7 = vld [vmem:[%s3952_s8 + $0x38] sm:$0xff]  }
 0x162   : > { %2585 = vmatprep.subr.bf16.mxu1 %v2788_v7 }
 0x163   : > { %v997_v9 = vmax.f32 %v964_v2, 0.0  ;;  %v1012_v12 = vpack.c.bf16 %v996_v5, %v994_v10 }
 0x165   : > { %v1013_v11 = vpack.c.bf16 %v997_v9, %v995_v6 }
 0x167   : > { %1237 = vmatprep.mubr.bf16.mxu1 %v1013_v11 }
 0x168   : > { %1238 = vmatmul.mubr.bf16.gmra.mxu1 %v1012_v12 }
 0x169   : > { %1410 = vmatprep.mubr.bf16.mxu1 %v3000_v14 }
 0x1f0   : > { %v2521_v15 = vpop.f32.mrf.mxu1 }
 0x1f2   : > { %v2522_v16 = vpop.f32.mrf.mxu1 }
 0x1f3   : > { %v2523_v17 = vadd.f32 %v2522_v16, %v2521_v15 }
 0x1f4   : > { %v2524_v19 = vpop.f32.mrf.mxu1 }
 0x1f5   : > { %v1184_v21 = vadd.f32 %v2523_v17, %v3411_v18 }
 0x1f6   : > { %v2525_v20 = vpop.f32.mrf.mxu1 }
 0x1f7   : > { %v2526_v22 = vadd.f32 %v2525_v20, %v2524_v19  ;;  %v1246_v26 = vmax.f32 %v1184_v21, 0.0 }
 0x1f8   : > { %v2527_v23 = vpop.f32.mrf.mxu1 }
 0x1f9   : > { %v1187_v24 = vadd.f32 %v2526_v22, %v3411_v18 }
 0x1fa   : > { %v2528_v25 = vpop.f32.mrf.mxu1 }
 0x1fb   : > { %v1247_v27 = vmax.f32 %v1187_v24, 0.0  ;;  %v2529_v28 = vadd.f32 %v2528_v25, %v2527_v23 }
 0x1fc   : > { %v2530_v29 = vpop.f32.mrf.mxu1 }
 0x1fd   : > { %v1262_v30 = vpack.c.bf16 %v1247_v27, %v1246_v26  ;;  %v1192_v33 = vadd.f32 %v2529_v28, %v3411_v18 }
 0x1fe   : > { %v2531_v32 = vpop.f32.mrf.mxu1 }
 0x1ff   : > { %v2532_v34 = vadd.f32 %v2531_v32, %v2530_v29  ;;  %1411 = vmatmul.mubr.bf16.vlgmr.msra.gmra.mxu1 %v1262_v30  ;;  %v1248_v39 = vmax.f32 %v1192_v33, 0.0 }
 0x200   : > { %v2533_v35 = vpop.f32.mrf.mxu1  ;;  %1420 = vmatprep.mubr.bf16.mxu1 %v3000_v14  ;;  %2586 = vmatpush3.bf16.msra.mxu1 %v2788_v7 }
 0x201   : > { %v1195_v36 = vadd.f32 %v2532_v34, %v3411_v18  ;;  %2587 = vmatprep.subr.bf16.mxu1 %v2789_v31 }
 0x202   : > { %v2534_v38 = vpop.f32.mrf.mxu1 }
 0x203   : > { %v1249_v40 = vmax.f32 %v1195_v36, 0.0  ;;  %v2535_v41 = vadd.f32 %v2534_v38, %v2533_v35 }
 0x204   : > { %v2536_v42 = vpop.f32.mrf.mxu1  ;;  %2588 = vmatpush3.bf16.msra.mxu1 %v2789_v31 }
 0x205   : > { %v1263_v43 = vpack.c.bf16 %v1249_v40, %v1248_v39  ;;  %2589 = vmatprep.subr.bf16.mxu1 %v2790_v37  ;;  %v1200_v45 = vadd.f32 %v2535_v41, %v3411_v18 }
 0x206   : > { %v2537_v44 = vpop.f32.mrf.mxu1 }
 0x207   : > { %v2538_v46 = vadd.f32 %v2537_v44, %v2536_v42  ;;  %1421 = vmatmul.mubr.bf16.gmra.mxu1 %v1263_v43  ;;  %v1250_v50 = vmax.f32 %v1200_v45, 0.0 }
 0x208   : > { %v2539_v47 = vpop.f32.mrf.mxu1  ;;  %1430 = vmatprep.mubr.bf16.mxu1 %v3000_v14  ;;  %2590 = vmatpush3.bf16.msra.mxu1 %v2790_v37 }
 0x209   : > { %v1203_v48 = vadd.f32 %v2538_v46, %v3411_v18  ;;  %v2791_v46 = vld [vmem:[%s3952_s8 + $0x20] sm:$0xff]  }
 0x20a   : > { %v2540_v49 = vpop.f32.mrf.mxu1  ;;  %2591 = vmatprep.subr.bf16.mxu1 %v2791_v46 }
 0x20b   : > { %v1251_v51 = vmax.f32 %v1203_v48, 0.0  ;;  %v2541_v52 = vadd.f32 %v2540_v49, %v2539_v47  ;;  %v2792_v47 = vld [vmem:[%s3952_s8 + $0x18] sm:$0xff]   ;;  %v2794_v48 = vld [vmem:[%s3952_s8 + $0x8] sm:$0xff]   ;;  %v2795_v49 = vld [vmem:[%s3952_s8] sm:$0xff]  }
 0x20c   : > { %v2542_v53 = vpop.f32.mrf.mxu1  ;;  %2592 = vmatpush3.bf16.msra.mxu1 %v2791_v46 }
 0x20d   : > { %v1264_v54 = vpack.c.bf16 %v1251_v51, %v1250_v50  ;;  %v1208_v56 = vadd.f32 %v2541_v52, %v3411_v18  ;;  %2593 = vmatprep.subr.bf16.mxu1 %v2792_v47  ;;  %v2796_v50 = vld [vmem:[%s3954_s10 + $0x70] ss:$8 sps:$4 sm:$0xff]   ;;  %v2798_v51 = vld [vmem:[%s3954_s10 + $0x74] ss:$8 sps:$4 sm:$0xff]   ;;  %v2801_v52 = vld [vmem:[%s3954_s10 + $0x64] ss:$8 sps:$4 sm:$0xff]  }
 0x20e   : > { %v2543_v55 = vpop.f32.mrf.mxu1  ;;  %1895 = vmatprep.subr.bf16.mxu0 %v2798_v51 }
 0x20f   : > { %v2544_v57 = vadd.f32 %v2543_v55, %v2542_v53  ;;  %1431 = vmatmul.mubr.bf16.gmra.mxu1 %v1264_v54  ;;  %v1252_v61 = vmax.f32 %v1208_v56, 0.0  ;;  %1896 = vmatpush1.bf16.msra.mxu0 %v2796_v50  ;;  %v2799_v53 = vld [vmem:[%s3954_s10 + $0x60] ss:$8 sps:$4 sm:$0xff]   ;;  %v2804_v54 = vld [vmem:[%s3954_s10 + $0x54] ss:$8 sps:$4 sm:$0xff]  }
 0x210   : > { %v2545_v58 = vpop.f32.mrf.mxu1  ;;  %1440 = vmatprep.mubr.bf16.mxu1 %v3000_v14  ;;  %2594 = vmatpush3.bf16.msra.mxu1 %v2792_v47  ;;  %v2802_v55 = vld [vmem:[%s3954_s10 + $0x50] ss:$8 sps:$4 sm:$0xff]   ;;  %v2807_v56 = vld [vmem:[%s3954_s10 + $0x44] ss:$8 sps:$4 sm:$0xff]  }
 0x211   : > { %v1211_v59 = vadd.f32 %v2544_v57, %v3411_v18  ;;  %1897 = vmatprep.subr.bf16.mxu0 %v2801_v52  ;;  %v2805_v57 = vld [vmem:[%s3954_s10 + $0x40] ss:$8 sps:$4 sm:$0xff]  }
 0x212   : > { %v2546_v60 = vpop.f32.mrf.mxu1 }
 0x213   : > { %v1253_v62 = vmax.f32 %v1211_v59, 0.0  ;;  %v2547_v63 = vadd.f32 %v2546_v60, %v2545_v58  ;;  %1898 = vmatpush1.bf16.msra.mxu0 %v2799_v53  ;;  %v2810_v58 = vld [vmem:[%s3954_s10 + $0x34] ss:$8 sps:$4 sm:$0xff]   ;;  %v2808_v59 = vld [vmem:[%s3954_s10 + $0x30] ss:$8 sps:$4 sm:$0xff]  }
 0x214   : > { %v2548_v0 = vpop.f32.mrf.mxu1  ;;  %1899 = vmatprep.subr.bf16.mxu0 %v2804_v54  ;;  %v2813_v60 = vld [vmem:[%s3954_s10 + $0x24] ss:$8 sps:$4 sm:$0xff]   ;;  %v1541_v54 = vld [vmem:[%s3549_s23 + $0x10] sm:$0xff] }
 0x215   : > { %v1265_v1 = vpack.c.bf16 %v1253_v62, %v1252_v61  ;;  %v1216_v5 = vadd.f32 %v2547_v63, %v3411_v18  ;;  %v2811_v61 = vld [vmem:[%s3954_s10 + $0x20] ss:$8 sps:$4 sm:$0xff]   ;;  %v2816_v62 = vld [vmem:[%s3954_s10 + $0x14] ss:$8 sps:$4 sm:$0xff]   ;;  %v2814_v63 = vld [vmem:[%s3954_s10 + $0x10] ss:$8 sps:$4 sm:$0xff]  }
 0x216   : > { %v2549_v2 = vpop.f32.mrf.mxu1 }
 0x217   : > { %v2550_v6 = vadd.f32 %v2549_v2, %v2548_v0  ;;  %1441 = vmatmul.mubr.bf16.gmra.mxu1 %v1265_v1  ;;  %v1254_v12 = vmax.f32 %v1216_v5, 0.0  ;;  %1900 = vmatpush1.bf16.msra.mxu0 %v2802_v55  ;;  %v1286_v0 = vld [vmem:[%s3951_s7] sm:$0x3] }
 0x218   : > { %v2551_v9 = vpop.f32.mrf.mxu1  ;;  %1450 = vmatprep.mubr.bf16.mxu1 %v3000_v14  ;;  %1901 = vmatprep.subr.bf16.mxu0 %v2807_v56  ;;  %v3509_v1 = vrot.slane %v1286_v0, %v3315_v4  ;;  %v3512_v2 = vrot.slane %v1286_v0, %v3313_v3 }
 0x219   : > { %v1219_v10 = vadd.f32 %v2550_v6, %v3411_v18 }
 0x21a   : > { %v2552_v11 = vpop.f32.mrf.mxu1 }
 0x21b   : > { %v1255_v13 = vmax.f32 %v1219_v10, 0.0  ;;  %v2553_v8 = vadd.f32 %v2552_v11, %v2551_v9  ;;  %1902 = vmatpush1.bf16.msra.mxu0 %v2805_v57 }
 0x21c   : > { %v2554_v7 = vpop.f32.mrf.mxu1  ;;  %1903 = vmatprep.subr.bf16.mxu0 %v2810_v58 }
 0x21d   : > { %v1266_v15 = vpack.c.bf16 %v1255_v13, %v1254_v12  ;;  %v1224_v17 = vadd.f32 %v2553_v8, %v3411_v18 }
 0x21e   : > { %v2555_v16 = vpop.f32.mrf.mxu1 }
 0x21f   : > { %v2556_v19 = vadd.f32 %v2555_v16, %v2554_v7  ;;  %1451 = vmatmul.mubr.bf16.gmra.mxu1 %v1266_v15  ;;  %v1256_v23 = vmax.f32 %v1224_v17, 0.0  ;;  %1904 = vmatpush1.bf16.msra.mxu0 %v2808_v59 }
 0x220   : > { %v2557_v20 = vpop.f32.mrf.mxu1  ;;  %1460 = vmatprep.mubr.bf16.mxu1 %v3000_v14  ;;  %1905 = vmatprep.subr.bf16.mxu0 %v2813_v60 }
 0x221   : > { %v1227_v21 = vadd.f32 %v2556_v19, %v3411_v18 }
 0x222   : > { %v2558_v22 = vpop.f32.mrf.mxu1 }
 0x223   : > { %v1257_v24 = vmax.f32 %v1227_v21, 0.0  ;;  %v2559_v25 = vadd.f32 %v2558_v22, %v2557_v20  ;;  %1906 = vmatpush1.bf16.msra.mxu0 %v2811_v61 }
 0x224   : > { %v2560_v26 = vpop.f32.mrf.mxu1  ;;  %1907 = vmatprep.subr.bf16.mxu0 %v2816_v62 }
 0x225   : > { %v1267_v27 = vpack.c.bf16 %v1257_v24, %v1256_v23  ;;  %v1232_v29 = vadd.f32 %v2559_v25, %v3411_v18 }
 0x226   : > { %v2561_v28 = vpop.f32.mrf.mxu1 }
 0x227   : > { %v2562_v30 = vadd.f32 %v2561_v28, %v2560_v26  ;;  %1461 = vmatmul.mubr.bf16.gmra.mxu1 %v1267_v27  ;;  %v1258_v34 = vmax.f32 %v1232_v29, 0.0  ;;  %1908 = vmatpush1.bf16.msra.mxu0 %v2814_v63 }
 0x228   : > { %v2563_v31 = vpop.f32.mrf.mxu1  ;;  %1470 = vmatprep.mubr.bf16.mxu1 %v3000_v14 }
 0x229   : > { %v1235_v32 = vadd.f32 %v2562_v30, %v3411_v18 }
 0x22a   : > { %v2564_v33 = vpop.f32.mrf.mxu1 }
 0x22b   : > { %v1259_v35 = vmax.f32 %v1235_v32, 0.0  ;;  %v2565_v36 = vadd.f32 %v2564_v33, %v2563_v31 }
 0x22c   : > { %v2566_v37 = vpop.f32.mrf.mxu1 }
 0x22d   : > { %v1268_v38 = vpack.c.bf16 %v1259_v35, %v1258_v34  ;;  %v1240_v40 = vadd.f32 %v2565_v36, %v3411_v18  ;;  %v1539_v36 = vld [vmem:[%s3549_s23] sm:$0xff] }
 0x22e   : > { %v2567_v39 = vpop.f32.mrf.mxu1 }
 0x22f   : > { %v2568_v41 = vadd.f32 %v2567_v39, %v2566_v37  ;;  %1471 = vmatmul.mubr.bf16.gmra.mxu1 %v1268_v38  ;;  %v1260_v43 = vmax.f32 %v1240_v40, 0.0 }
 0x230   : > { %1480 = vmatprep.mubr.bf16.mxu1 %v3000_v14 }
 0x231   : > { %v1243_v42 = vadd.f32 %v2568_v41, %v3411_v18  ;;  %v2793_v18 = vld [vmem:[%s3952_s8 + $0x10] sm:$0xff]  }
 0x232   : > { %2595 = vmatprep.subr.bf16.mxu1 %v2793_v18 }
 0x233   : > { %v1261_v44 = vmax.f32 %v1243_v42, 0.0  ;;  %2596 = vmatpush3.bf16.msra.mxu1 %v2793_v18 }
 0x234   : > { %2597 = vmatprep.subr.bf16.mxu1 %v2794_v48 }
 0x235   : > { %v1269_v45 = vpack.c.bf16 %v1261_v44, %v1260_v43 }
 0x237   : > { %1481 = vmatmul.mubr.bf16.gmra.mxu1 %v1269_v45  ;;  %v1540_v45 = vld [vmem:[%s3549_s23 + $0x8] sm:$0xff] }
 0x238   : > { %2598 = vmatpush3.bf16.msra.mxu1 %v2794_v48 }
 0x239   : > { %2599 = vmatprep.subr.bf16.mxu1 %v2795_v49 }
 0x23c   : > { %2600 = vmatpush3.bf16.msra.mxu1 %v2795_v49 }
 0x2bf   : > { %v1412_v5 = vpop.f32.mrf.mxu1 }
 0x2c0   : > { %v1413_v6 = vadd.f32 %v1412_v5, %v3509_v1  ;;  %v1542_v5 = vld [vmem:[%s3549_s23 + $0x18] sm:$0xff] }
 0x2c1   : > { %v1414_v9 = vpop.f32.mrf.mxu1 }
 0x2c2   : > { %2072 = vst [vmem:[%s3516_s24] sm:$0xff] %v1413_v6  ;;  %v1415_v10 = vadd.f32 %v1414_v9, %v3512_v2 }
 0x2c3   : > { %v1416_v11 = vpop.f32.mrf.mxu1 }
 0x2c4   : > { %v1491_v12 = vmul.f32 0.5, %v1415_v10  ;;  %2088 = vst [vmem:[%s3521_s29] sm:$0xff] %v1415_v10  ;;  %v3525_v13 = vadd.f32 %v1416_v11, %v3509_v1 }
 0x2c5   : > { %v1418_v8 = vpop.f32.mrf.mxu1 }
 0x2c6   : > { %v1507_v7 = vmul.f32 1.442695, %v1491_v12  ;;  %2073 = vst [vmem:[%s3516_s24 + $0x8] sm:$0xff] %v3525_v13  ;;  %v1419_v15 = vadd.f32 %v1418_v8, %v3512_v2 }
 0x2c7   : > { %v1422_v16 = vpop.f32.mrf.mxu1 }
 0x2c8   : > { %2820 = vpow2.f32 %v1507_v7  ;;  %v1492_v17 = vmul.f32 0.5, %v1419_v15  ;;  %2089 = vst [vmem:[%s3521_s29 + $0x8] sm:$0xff] %v1419_v15  ;;  %v3532_v19 = vadd.f32 %v1422_v16, %v3509_v1  ;;  %v1543_v16 = vld [vmem:[%s3549_s23 + $0x20] sm:$0xff] }
 0x2c9   : > { %v1424_v20 = vpop.f32.mrf.mxu1 }
 0x2ca   : > { %v1509_v21 = vmul.f32 1.442695, %v1492_v17  ;;  %2074 = vst [vmem:[%s3516_s24 + $0x10] sm:$0xff] %v3532_v19  ;;  %v1425_v22 = vadd.f32 %v1424_v20, %v3512_v2 }
 0x2cb   : > { %v1426_v23 = vpop.f32.mrf.mxu1 }
 0x2cc   : > { %2822 = vpow2.f32 %v1509_v21  ;;  %v1493_v24 = vmul.f32 0.5, %v1425_v22  ;;  %2090 = vst [vmem:[%s3521_s29 + $0x10] sm:$0xff] %v1425_v22  ;;  %v3539_v25 = vadd.f32 %v1426_v23, %v3509_v1 }
 0x2cd   : > { %v1428_v26 = vpop.f32.mrf.mxu1 }
 0x2ce   : > { %v1511_v27 = vmul.f32 1.442695, %v1493_v24  ;;  %2075 = vst [vmem:[%s3516_s24 + $0x18] sm:$0xff] %v3539_v25  ;;  %v1429_v28 = vadd.f32 %v1428_v26, %v3512_v2 }
 0x2cf   : > { %v1432_v29 = vpop.f32.mrf.mxu1 }
 0x2d0   : > { %2824 = vpow2.f32 %v1511_v27  ;;  %v1494_v30 = vmul.f32 0.5, %v1429_v28  ;;  %2091 = vst [vmem:[%s3521_s29 + $0x18] sm:$0xff] %v1429_v28  ;;  %v3553_v31 = vadd.f32 %v1432_v29, %v3509_v1  ;;  %v1544_v29 = vld [vmem:[%s3549_s23 + $0x28] sm:$0xff] }
 0x2d1   : > { %v1434_v32 = vpop.f32.mrf.mxu1 }
 0x2d2   : > { %v1513_v33 = vmul.f32 1.442695, %v1494_v30  ;;  %2076 = vst [vmem:[%s3516_s24 + $0x20] sm:$0xff] %v3553_v31  ;;  %v1435_v34 = vadd.f32 %v1434_v32, %v3512_v2 }
 0x2d3   : > { %v1436_v35 = vpop.f32.mrf.mxu1 }
 0x2d4   : > { %2826 = vpow2.f32 %v1513_v33  ;;  %v1495_v37 = vmul.f32 0.5, %v1435_v34  ;;  %2092 = vst [vmem:[%s3521_s29 + $0x20] sm:$0xff] %v1435_v34  ;;  %v3561_v38 = vadd.f32 %v1436_v35, %v3509_v1 }
 0x2d5   : > { %v2821_v39 = vpop.eup %2820  ;;  %v1438_v40 = vpop.f32.mrf.mxu1 }
 0x2d6   : > { %v1515_v41 = vmul.f32 1.442695, %v1495_v37  ;;  %2077 = vst [vmem:[%s3516_s24 + $0x28] sm:$0xff] %v3561_v38  ;;  %v1439_v42 = vadd.f32 %v1438_v40, %v3512_v2  ;;  %v1555_v43 = vmul.f32 %v2821_v39, %v1539_v36  ;;  %v1545_v40 = vld [vmem:[%s3549_s23 + $0x30] sm:$0xff] }
 0x2d7   : > { %v1442_v44 = vpop.f32.mrf.mxu1 }
 0x2d8   : > { %2828 = vpow2.f32 %v1515_v41  ;;  %v1496_v46 = vmul.f32 0.5, %v1439_v42  ;;  %2093 = vst [vmem:[%s3521_s29 + $0x28] sm:$0xff] %v1439_v42  ;;  %v3569_v47 = vadd.f32 %v1442_v44, %v3509_v1  ;;  %v1571_v18 = vadd.f32 %v1555_v43, %v1413_v6 }
 0x2d9   : > { %v2823_v48 = vpop.eup %2822  ;;  %v1444_v49 = vpop.f32.mrf.mxu1 }
 0x2da   : > { %v1517_v50 = vmul.f32 1.442695, %v1496_v46  ;;  %2078 = vst [vmem:[%s3516_s24 + $0x30] sm:$0xff] %v3569_v47  ;;  %v1445_v51 = vadd.f32 %v1444_v49, %v3512_v2  ;;  %v1556_v52 = vmul.f32 %v2823_v48, %v1540_v45  ;;  %2104 = vst [vmem:[%s3575_s30] sm:$0xff] %v1571_v18 }
 0x2db   : > { %v1446_v53 = vpop.f32.mrf.mxu1 }
 0x2dc   : > { %2830 = vpow2.f32 %v1517_v50  ;;  %v1497_v55 = vmul.f32 0.5, %v1445_v51  ;;  %2094 = vst [vmem:[%s3521_s29 + $0x30] sm:$0xff] %v1445_v51  ;;  %v3581_v56 = vadd.f32 %v1446_v53, %v3509_v1  ;;  %v1572_v57 = vadd.f32 %v1556_v52, %v3525_v13  ;;  %v1546_v50 = vld [vmem:[%s3549_s23 + $0x38] sm:$0xff] }
 0x2dd   : > { %v2825_v58 = vpop.eup %2824  ;;  %v1448_v59 = vpop.f32.mrf.mxu1 }
 0x2de   : > { %v1519_v60 = vmul.f32 1.442695, %v1497_v55  ;;  %2079 = vst [vmem:[%s3516_s24 + $0x38] sm:$0xff] %v3581_v56  ;;  %v1449_v61 = vadd.f32 %v1448_v59, %v3512_v2  ;;  %v1587_v62 = vpack.c.bf16 %v1572_v57, %v1571_v18  ;;  %2105 = vst [vmem:[%s3575_s30 + $0x8] sm:$0xff] %v1572_v57  ;;  %v1557_v63 = vmul.f32 %v2825_v58, %v1541_v54 }
 0x2df   : > { %v1452_v0 = vpop.f32.mrf.mxu1 }
 0x2e0   : > { %2832 = vpow2.f32 %v1519_v60  ;;  %v1498_v6 = vmul.f32 0.5, %v1449_v61  ;;  %2095 = vst [vmem:[%s3521_s29 + $0x38] sm:$0xff] %v1449_v61  ;;  %v3591_v9 = vadd.f32 %v1452_v0, %v3509_v1  ;;  %2601 = vmatprep.mubr.bf16.mxu1 %v1587_v62  ;;  %v1573_v10 = vadd.f32 %v1557_v63, %v3532_v19  ;;  %v1547_v60 = vld [vmem:[%s3549_s23 + $0x40] sm:$0xff] }
 0x2e1   : > { %v2827_v11 = vpop.eup %2826  ;;  %v1454_v12 = vpop.f32.mrf.mxu1 }
 0x2e2   : > { %v1521_v13 = vmul.f32 1.442695, %v1498_v6  ;;  %2080 = vst [vmem:[%s3516_s24 + $0x40] sm:$0xff] %v3591_v9  ;;  %v1455_v8 = vadd.f32 %v1454_v12, %v3512_v2  ;;  %v1558_v7 = vmul.f32 %v2827_v11, %v1542_v5  ;;  %2106 = vst [vmem:[%s3575_s30 + $0x10] sm:$0xff] %v1573_v10 }
 0x2e3   : > { %v1456_v15 = vpop.f32.mrf.mxu1 }
 0x2e4   : > { %2834 = vpow2.f32 %v1521_v13  ;;  %v1499_v17 = vmul.f32 0.5, %v1455_v8  ;;  %2096 = vst [vmem:[%s3521_s29 + $0x40] sm:$0xff] %v1455_v8  ;;  %v3601_v19 = vadd.f32 %v1456_v15, %v3509_v1  ;;  %v1574_v20 = vadd.f32 %v1558_v7, %v3539_v25  ;;  %v1548_v13 = vld [vmem:[%s3549_s23 + $0x48] sm:$0xff] }
 0x2e5   : > { %v2829_v21 = vpop.eup %2828  ;;  %v1458_v22 = vpop.f32.mrf.mxu1 }
 0x2e6   : > { %v1523_v23 = vmul.f32 1.442695, %v1499_v17  ;;  %2081 = vst [vmem:[%s3516_s24 + $0x48] sm:$0xff] %v3601_v19  ;;  %v1459_v24 = vadd.f32 %v1458_v22, %v3512_v2  ;;  %v1588_v26 = vpack.c.bf16 %v1574_v20, %v1573_v10  ;;  %2107 = vst [vmem:[%s3575_s30 + $0x18] sm:$0xff] %v1574_v20  ;;  %v1559_v27 = vmul.f32 %v2829_v21, %v1543_v16 }
 0x2e7   : > { %v1462_v28 = vpop.f32.mrf.mxu1 }
 0x2e8   : > { %2836 = vpow2.f32 %v1523_v23  ;;  %v1500_v30 = vmul.f32 0.5, %v1459_v24  ;;  %2097 = vst [vmem:[%s3521_s29 + $0x48] sm:$0xff] %v1459_v24  ;;  %v3611_v25 = vadd.f32 %v1462_v28, %v3509_v1  ;;  %2602 = vmatmul.mubr.bf16.vlgmr.msra.gmra.mxu1 %v1588_v26  ;;  %v1575_v32 = vadd.f32 %v1559_v27, %v3553_v31  ;;  %v1549_v23 = vld [vmem:[%s3549_s23 + $0x50] sm:$0xff] }
 0x2e9   : > { %v2831_v33 = vpop.eup %2830  ;;  %v1464_v34 = vpop.f32.mrf.mxu1 }
 0x2ea   : > { %v1525_v35 = vmul.f32 1.442695, %v1500_v30  ;;  %2082 = vst [vmem:[%s3516_s24 + $0x50] sm:$0xff] %v3611_v25  ;;  %v1465_v36 = vadd.f32 %v1464_v34, %v3512_v2  ;;  %v1560_v37 = vmul.f32 %v2831_v33, %v1544_v29  ;;  %2108 = vst [vmem:[%s3575_s30 + $0x20] sm:$0xff] %v1575_v32  ;;  %v1550_v34 = vld [vmem:[%s3549_s23 + $0x58] sm:$0xff] }
 0x2eb   : > { %v1466_v39 = vpop.f32.mrf.mxu1 }
 0x2ec   : > { %2838 = vpow2.f32 %v1525_v35  ;;  %v1501_v41 = vmul.f32 0.5, %v1465_v36  ;;  %2098 = vst [vmem:[%s3521_s29 + $0x50] sm:$0xff] %v1465_v36  ;;  %v3621_v31 = vadd.f32 %v1466_v39, %v3509_v1  ;;  %v1576_v42 = vadd.f32 %v1560_v37, %v3561_v38  ;;  %v1551_v39 = vld [vmem:[%s3549_s23 + $0x60] sm:$0xff] }
 0x2ed   : > { %v2833_v43 = vpop.eup %2832  ;;  %v1468_v44 = vpop.f32.mrf.mxu1 }
 0x2ee   : > { %v1527_v45 = vmul.f32 1.442695, %v1501_v41  ;;  %2083 = vst [vmem:[%s3516_s24 + $0x58] sm:$0xff] %v3621_v31  ;;  %v1469_v46 = vadd.f32 %v1468_v44, %v3512_v2  ;;  %v1589_v18 = vpack.c.bf16 %v1576_v42, %v1575_v32  ;;  %2109 = vst [vmem:[%s3575_s30 + $0x28] sm:$0xff] %v1576_v42  ;;  %v1561_v48 = vmul.f32 %v2833_v43, %v1545_v40  ;;  %v1552_v43 = vld [vmem:[%s3549_s23 + $0x68] sm:$0xff] }
 0x2ef   : > { %v1472_v49 = vpop.f32.mrf.mxu1 }
 0x2f0   : > { %2840 = vpow2.f32 %v1527_v45  ;;  %v1502_v51 = vmul.f32 0.5, %v1469_v46  ;;  %2099 = vst [vmem:[%s3521_s29 + $0x58] sm:$0xff] %v1469_v46  ;;  %v3631_v38 = vadd.f32 %v1472_v49, %v3509_v1  ;;  %2605 = vmatprep.mubr.bf16.mxu1 %v1589_v18  ;;  %v1577_v52 = vadd.f32 %v1561_v48, %v3569_v47  ;;  %v1553_v46 = vld [vmem:[%s3549_s23 + $0x70] sm:$0xff] }
 0x2f1   : > { %v2835_v53 = vpop.eup %2834  ;;  %v1474_v54 = vpop.f32.mrf.mxu1 }
 0x2f2   : > { %v1529_v55 = vmul.f32 1.442695, %v1502_v51  ;;  %2084 = vst [vmem:[%s3516_s24 + $0x60] sm:$0xff] %v3631_v38  ;;  %v1475_v57 = vadd.f32 %v1474_v54, %v3512_v2  ;;  %v1562_v58 = vmul.f32 %v2835_v53, %v1546_v50  ;;  %2110 = vst [vmem:[%s3575_s30 + $0x30] sm:$0xff] %v1577_v52  ;;  %v1554_v50 = vld [vmem:[%s3549_s23 + $0x78] sm:$0xff] }
 0x2f3   : > { %v1476_v59 = vpop.f32.mrf.mxu1 }
 0x2f4   : > { %2842 = vpow2.f32 %v1529_v55  ;;  %v1503_v61 = vmul.f32 0.5, %v1475_v57  ;;  %2100 = vst [vmem:[%s3521_s29 + $0x60] sm:$0xff] %v1475_v57  ;;  %v3641_v47 = vadd.f32 %v1476_v59, %v3509_v1  ;;  %v1578_v62 = vadd.f32 %v1562_v58, %v3581_v56  ;;  %v2817_v57 = vld [vmem:[%s3954_s10] ss:$8 sps:$4 sm:$0xff]  }
 0x2f5   : > { %v2837_v63 = vpop.eup %2836  ;;  %v1478_v0 = vpop.f32.mrf.mxu1 }
 0x2f6   : > { %v1531_v5 = vmul.f32 1.442695, %v1503_v61  ;;  %2085 = vst [vmem:[%s3516_s24 + $0x68] sm:$0xff] %v3641_v47  ;;  %v1479_v6 = vadd.f32 %v1478_v0, %v3512_v2  ;;  %v1590_v10 = vpack.c.bf16 %v1578_v62, %v1577_v52  ;;  %2111 = vst [vmem:[%s3575_s30 + $0x38] sm:$0xff] %v1578_v62  ;;  %v1563_v11 = vmul.f32 %v2837_v63, %v1547_v60  ;;  %v3687_v60 = vld [vmem:[%s3953_s9] ss:$0 sm:$0xff] }
 0x2f7   : > { %v1482_v12 = vpop.f32.mrf.mxu1 }
 0x2f8   : > { %2844 = vpow2.f32 %v1531_v5  ;;  %v1504_v8 = vmul.f32 0.5, %v1479_v6  ;;  %2101 = vst [vmem:[%s3521_s29 + $0x68] sm:$0xff] %v1479_v6  ;;  %v1483_v56 = vadd.f32 %v1482_v12, %v3509_v1  ;;  %2606 = vmatmul.mubr.bf16.gmra.mxu1 %v1590_v10  ;;  %v1579_v7 = vadd.f32 %v1563_v11, %v3591_v9 }
 0x2f9   : > { %v2839_v15 = vpop.eup %2838  ;;  %v1484_v16 = vpop.f32.mrf.mxu1 }
 0x2fa   : > { %v1533_v17 = vmul.f32 1.442695, %v1504_v8  ;;  %2086 = vst [vmem:[%s3516_s24 + $0x70] sm:$0xff] %v1483_v56  ;;  %v1485_v20 = vadd.f32 %v1484_v16, %v3512_v2  ;;  %v1564_v21 = vmul.f32 %v2839_v15, %v1548_v13  ;;  %2112 = vst [vmem:[%s3575_s30 + $0x40] sm:$0xff] %v1579_v7 }
 0x2fb   : > { %v1486_v22 = vpop.f32.mrf.mxu1 }
 0x2fc   : > { %2846 = vpow2.f32 %v1533_v17  ;;  %v1505_v24 = vmul.f32 0.5, %v1485_v20  ;;  %2102 = vst [vmem:[%s3521_s29 + $0x70] sm:$0xff] %v1485_v20  ;;  %v1487_v26 = vadd.f32 %v1486_v22, %v3509_v1  ;;  %v1580_v9 = vadd.f32 %v1564_v21, %v3601_v19 }
 0x2fd   : > { %v2841_v27 = vpop.eup %2840  ;;  %v1488_v28 = vpop.f32.mrf.mxu1 }
 0x2fe   : > { %v1535_v29 = vmul.f32 1.442695, %v1505_v24  ;;  %2087 = vst [vmem:[%s3516_s24 + $0x78] sm:$0xff] %v1487_v26  ;;  %v1489_v30 = vadd.f32 %v1488_v28, %v3512_v2  ;;  %v1591_v32 = vpack.c.bf16 %v1580_v9, %v1579_v7  ;;  %2113 = vst [vmem:[%s3575_s30 + $0x48] sm:$0xff] %v1580_v9  ;;  %v1565_v33 = vmul.f32 %v2841_v27, %v1549_v23 }
 0x300   : > { %2848 = vpow2.f32 %v1535_v29  ;;  %v1506_v35 = vmul.f32 0.5, %v1489_v30  ;;  %2103 = vst [vmem:[%s3521_s29 + $0x78] sm:$0xff] %v1489_v30  ;;  %2609 = vmatprep.mubr.bf16.mxu1 %v1591_v32  ;;  %v1581_v1 = vadd.f32 %v1565_v33, %v3611_v25 }
 0x301   : > { %v2843_v19 = vpop.eup %2842 }
 0x302   : > { %v1537_v36 = vmul.f32 1.442695, %v1506_v35  ;;  %v1566_v37 = vmul.f32 %v2843_v19, %v1550_v34  ;;  %2114 = vst [vmem:[%s3575_s30 + $0x50] sm:$0xff] %v1581_v1 }
 0x304   : > { %2850 = vpow2.f32 %v1537_v36  ;;  %v1582_v2 = vadd.f32 %v1566_v37, %v3621_v31 }
 0x305   : > { %v2845_v40 = vpop.eup %2844 }
 0x306   : > { %v1592_v41 = vpack.c.bf16 %v1582_v2, %v1581_v1  ;;  %2115 = vst [vmem:[%s3575_s30 + $0x58] sm:$0xff] %v1582_v2  ;;  %v1567_v42 = vmul.f32 %v2845_v40, %v1551_v39 }
 0x308   : > { %2610 = vmatmul.mubr.bf16.gmra.mxu1 %v1592_v41  ;;  %v1583_v25 = vadd.f32 %v1567_v42, %v3631_v38  ;;  %v2819_v38 = vld [vmem:[%s3954_s10 + $0x4] ss:$8 sps:$4 sm:$0xff]  }
 0x309   : > { %v2847_v44 = vpop.eup %2846  ;;  %1909 = vmatprep.subr.bf16.mxu0 %v2819_v38 }
 0x30a   : > { %v1568_v45 = vmul.f32 %v2847_v44, %v1552_v43  ;;  %2116 = vst [vmem:[%s3575_s30 + $0x60] sm:$0xff] %v1583_v25  ;;  %1910 = vmatpush1.bf16.msra.mxu0 %v2817_v57 }
 0x30c   : > { %v1584_v18 = vadd.f32 %v1568_v45, %v3641_v47 }
 0x30d   : > { %v2849_v48 = vpop.eup %2848 }
 0x30e   : > { %v1593_v49 = vpack.c.bf16 %v1584_v18, %v1583_v25  ;;  %2117 = vst [vmem:[%s3575_s30 + $0x68] sm:$0xff] %v1584_v18  ;;  %v1569_v31 = vmul.f32 %v2849_v48, %v1553_v46 }
 0x310   : > { %2613 = vmatprep.mubr.bf16.mxu1 %v1593_v49  ;;  %v1585_v51 = vadd.f32 %v1569_v31, %v1483_v56 }
 0x311   : > { %v2851_v52 = vpop.eup %2850 }
 0x312   : > { %v1570_v53 = vmul.f32 %v2851_v52, %v1554_v50  ;;  %2118 = vst [vmem:[%s3575_s30 + $0x70] sm:$0xff] %v1585_v51 }
 0x314   : > { %v1586_v54 = vadd.f32 %v1570_v53, %v1487_v26 }
 0x316   : > { %v1594_v55 = vpack.c.bf16 %v1586_v54, %v1585_v51  ;;  %2119 = vst [vmem:[%s3575_s30 + $0x78] sm:$0xff] %v1586_v54 }
 0x318   : > { %2614 = vmatmul.mubr.bf16.gmra.mxu1 %v1594_v55 }
 0x3a8   : > { %v2603_v58 = vpop.f32.mrf.mxu1 }
 0x3a9   : > { %v1709_v11 = vadd.f32 %v2603_v58, %v3687_v60 }
 0x3aa   : > { %v1700_v59 = vpop.f32.mrf.mxu1 }
 0x3ab   : > { %v1701_v47 = vadd.f32 %v3687_v60, %v1700_v59  ;;  %v1765_v8 = vmax.f32 %v1709_v11, 0.0 }
 0x3ac   : > { %v2604_v61 = vpop.f32.mrf.mxu1 }
 0x3ad   : > { %v1763_v0 = vmax.f32 %v1701_v47, 0.0  ;;  %v1712_v6 = vadd.f32 %v2604_v61, %v3687_v60 }
 0x3ae   : > { %v1703_v62 = vpop.f32.mrf.mxu1 }
 0x3af   : > { %v1704_v63 = vadd.f32 %v3687_v60, %v1703_v62  ;;  %v1766_v12 = vmax.f32 %v1712_v6, 0.0 }
 0x3b1   : > { %v1764_v5 = vmax.f32 %v1704_v63, 0.0  ;;  %v1780_v7 = vpack.c.bf16 %v1766_v12, %v1765_v8 }
 0x3b3   : > { %v1779_v10 = vpack.c.bf16 %v1764_v5, %v1763_v0 }
 0x3b5   : > { %1928 = vmatmul.mubr.bf16.vlgmr.msra.gmra.mxu0 %v1779_v10 }
 0x3b6   : > { %1937 = vmatprep.mubr.bf16.mxu0 %v3000_v14 }
 0x3b8   : > { %v2607_v13 = vpop.f32.mrf.mxu1 }
 0x3b9   : > { %v1725_v26 = vadd.f32 %v2607_v13, %v3687_v60 }
 0x3ba   : > { %v1716_v56 = vpop.f32.mrf.mxu1 }
 0x3bb   : > { %v1717_v16 = vadd.f32 %v3687_v60, %v1716_v56  ;;  %v1769_v28 = vmax.f32 %v1725_v26, 0.0 }
 0x3bc   : > { %v2608_v15 = vpop.f32.mrf.mxu1 }
 0x3bd   : > { %1938 = vmatmul.mubr.bf16.gmra.mxu0 %v1780_v7  ;;  %v1767_v21 = vmax.f32 %v1717_v16, 0.0  ;;  %v1728_v23 = vadd.f32 %v2608_v15, %v3687_v60 }
 0x3be   : > { %v1719_v17 = vpop.f32.mrf.mxu1  ;;  %1947 = vmatprep.mubr.bf16.mxu0 %v3000_v14 }
 0x3bf   : > { %v1720_v20 = vadd.f32 %v3687_v60, %v1719_v17  ;;  %v1770_v9 = vmax.f32 %v1728_v23, 0.0 }
 0x3c1   : > { %v1768_v22 = vmax.f32 %v1720_v20, 0.0  ;;  %v1782_v30 = vpack.c.bf16 %v1770_v9, %v1769_v28 }
 0x3c3   : > { %v1781_v24 = vpack.c.bf16 %v1768_v22, %v1767_v21 }
 0x3c5   : > { %1948 = vmatmul.mubr.bf16.gmra.mxu0 %v1781_v24 }
 0x3c6   : > { %1957 = vmatprep.mubr.bf16.mxu0 %v3000_v14 }
 0x3c8   : > { %v2611_v27 = vpop.f32.mrf.mxu1 }
 0x3c9   : > { %v1741_v39 = vadd.f32 %v2611_v27, %v3687_v60 }
 0x3ca   : > { %v1732_v29 = vpop.f32.mrf.mxu1 }
 0x3cb   : > { %v1733_v33 = vadd.f32 %v3687_v60, %v1732_v29  ;;  %v1773_v41 = vmax.f32 %v1741_v39, 0.0 }
 0x3cc   : > { %v2612_v32 = vpop.f32.mrf.mxu1 }
 0x3cd   : > { %1958 = vmatmul.mubr.bf16.gmra.mxu0 %v1782_v30  ;;  %v1771_v1 = vmax.f32 %v1733_v33, 0.0  ;;  %v1744_v36 = vadd.f32 %v2612_v32, %v3687_v60 }
 0x3ce   : > { %v1735_v34 = vpop.f32.mrf.mxu1  ;;  %1967 = vmatprep.mubr.bf16.mxu0 %v3000_v14 }
 0x3cf   : > { %v1736_v35 = vadd.f32 %v3687_v60, %v1735_v34  ;;  %v1774_v2 = vmax.f32 %v1744_v36, 0.0 }
 0x3d1   : > { %v1772_v19 = vmax.f32 %v1736_v35, 0.0  ;;  %v1784_v43 = vpack.c.bf16 %v1774_v2, %v1773_v41 }
 0x3d3   : > { %v1783_v37 = vpack.c.bf16 %v1772_v19, %v1771_v1 }
 0x3d5   : > { %1968 = vmatmul.mubr.bf16.gmra.mxu0 %v1783_v37 }
 0x3d6   : > { %1977 = vmatprep.mubr.bf16.mxu0 %v3000_v14 }
 0x3d8   : > { %v2615_v40 = vpop.f32.mrf.mxu1 }
 0x3d9   : > { %v1757_v50 = vadd.f32 %v2615_v40, %v3687_v60 }
 0x3da   : > { %v1748_v42 = vpop.f32.mrf.mxu1 }
 0x3db   : > { %v1749_v44 = vadd.f32 %v3687_v60, %v1748_v42  ;;  %v1777_v52 = vmax.f32 %v1757_v50, 0.0 }
 0x3dc   : > { %v2616_v25 = vpop.f32.mrf.mxu1 }
 0x3dd   : > { %1978 = vmatmul.mubr.bf16.gmra.mxu0 %v1784_v43  ;;  %v1775_v18 = vmax.f32 %v1749_v44, 0.0  ;;  %v1760_v49 = vadd.f32 %v2616_v25, %v3687_v60 }
 0x3de   : > { %v1751_v45 = vpop.f32.mrf.mxu1  ;;  %1987 = vmatprep.mubr.bf16.mxu0 %v3000_v14 }
 0x3df   : > { %v1752_v46 = vadd.f32 %v3687_v60, %v1751_v45  ;;  %v1778_v51 = vmax.f32 %v1760_v49, 0.0 }
 0x3e1   : > { %v1776_v48 = vmax.f32 %v1752_v46, 0.0  ;;  %v1786_v53 = vpack.c.bf16 %v1778_v51, %v1777_v52 }
 0x3e3   : > { %v1785_v31 = vpack.c.bf16 %v1776_v48, %v1775_v18 }
 0x3e5   : > { %1988 = vmatmul.mubr.bf16.gmra.mxu0 %v1785_v31 }
 0x3e6   : > { %1997 = vmatprep.mubr.bf16.mxu0 %v3000_v14 }
 0x3ed   : > { %1998 = vmatmul.mubr.bf16.gmra.mxu0 %v1786_v53 }
 0x3ee   : > { %2865 = shalt.err (!%p2862_p3)
}
 0x3ef   : > { %s2866_s24 = scalar_lea.hbm %s3720_s17, 2048  ;;  %s2870_s0 = scalar_lea.hbm %s3957_s13, 4096 }
 0x3f0   : > { %p2867_p4 = scmp.ne.s32.totalorder %s3720_s17, %s2866_s24  ;;  %p2871_p9 = scmp.lt.s32.totalorder %s3720_s17, %s3957_s13 }
 0x3f1   : > { %p2872_p10 = scmp.lt.s32.totalorder %s2870_s0, %s2866_s24 }
 0x3f2   : > { %p2868_p7 = pnand %p2867_p4, %p3129_p5 }
 0x3f3   : > { %p2873_p11 = por %p2872_p10, %p2871_p9 }
 0x3f4   : > { %p2869_p8 = pneg %p2868_p7 }
 0x3f6   : > { %p2874_p12 = pnand %p2873_p11, %p2869_p8 }
 0x3f8   : > { %2877 = shalt.err (!%p2874_p12)
}
 0x3f9   : > { %s3002_s1 = smov 128   ;;  %s3003_s2 = smov 8  }
 0x3fa   : > { %2618 = dma.vmem_to_hbm [thread:$0]  (%p3129_p5), %s3723_s25, 2048, %s3720_s17, %s3725_s20, %s3002_s1, %s3002_s1, %s3003_s2  }
 0x3fb   : > { %s3755_s24 = scalar_lea.hbm %s3958_s14, %s3714_s16  ;;  %s2182_s26 = sshll.u32 %s3521_s29, 4  ;;  %s3758_s26 = int_to_ptr.vmem [resolvable:$true] %s2182_s26 }
 0x3fc   : > { %s3764_s21 = scalar_lea.hbm %s3959_s15, %s3714_s16  ;;  %s2878_s4 = scalar_lea.vmem %s3758_s26, 2048 }
 0x3fd   : > { %p2879_p13 = scmp.ne.s32.totalorder %s3758_s26, %s2878_s4  ;;  %s3004_s17 = smov [#allocation6]  }
 0x3fe   : > { %s2882_s25 = sshll.u32 %s3004_s17, 4  ;;  %s2883_s25 = int_to_ptr.vmem [resolvable:$false] %s2882_s25 }
 0x3ff   : > { %p2880_p0 = pnand %p2879_p13, %p3129_p5  ;;  %s2884_s3 = scalar_lea.vmem %s2883_s25, 4096 }
 0x400   : > { %p2885_p2 = scmp.lt.s32.totalorder %s3758_s26, %s2883_s25  ;;  %p2886_p3 = scmp.lt.s32.totalorder %s2884_s3, %s2878_s4 }
 0x401   : > { %p2881_p1 = pneg %p2880_p0 }
 0x402   : > { %p2887_p4 = por %p2886_p3, %p2885_p2 }
 0x404   : > { %p2888_p7 = pnand %p2887_p4, %p2881_p1 }
 0x406   : > { %2891 = shalt.err (!%p2888_p7)
}
 0x407   : > { %s2892_s29 = scalar_lea.hbm %s3755_s24, 2048  ;;  %s2896_s23 = scalar_lea.hbm %s3958_s14, 4096 }
 0x408   : > { %p2893_p8 = scmp.ne.s32.totalorder %s3755_s24, %s2892_s29  ;;  %p2897_p11 = scmp.lt.s32.totalorder %s3755_s24, %s3958_s14 }
 0x409   : > { %p2898_p12 = scmp.lt.s32.totalorder %s2896_s23, %s2892_s29 }
 0x40a   : > { %p2894_p9 = pnand %p2893_p8, %p3129_p5 }
 0x40b   : > { %p2899_p13 = por %p2898_p12, %p2897_p11 }
 0x40c   : > { %p2895_p10 = pneg %p2894_p9 }
 0x40e   : > { %p2900_p0 = pnand %p2899_p13, %p2895_p10 }
 0x410   : > { %2903 = shalt.err (!%p2900_p0)
}
 0x411   : > { %2619 = dma.vmem_to_hbm [thread:$0]  (%p3129_p5), %s3758_s26, 2048, %s3755_s24, %s3725_s20, %s3002_s1, %s3002_s1, %s3003_s2  }
 0x412   : > { %s2198_s4 = sshll.u32 %s3575_s30, 4  ;;  %s2136_s25 = scalar_lea.sflag [#allocation8], %s3500_s18  ;;  %s3791_s4 = int_to_ptr.vmem [resolvable:$true] %s2198_s4 }
 0x413   : > { %s2904_s3 = scalar_lea.vmem %s3791_s4, 2048  ;;  %s3005_s29 = smov [#allocation7]  }
 0x414   : > { %p2905_p1 = scmp.ne.s32.totalorder %s3791_s4, %s2904_s3  ;;  %s2908_s16 = sshll.u32 %s3005_s29, 4  ;;  %s2909_s16 = int_to_ptr.vmem [resolvable:$false] %s2908_s16 }
 0x415   : > { %s2910_s27 = scalar_lea.vmem %s2909_s16, 4096  ;;  %p2911_p4 = scmp.lt.s32.totalorder %s3791_s4, %s2909_s16 }
 0x416   : > { %p2906_p2 = pnand %p2905_p1, %p3129_p5  ;;  %p2912_p7 = scmp.lt.s32.totalorder %s2910_s27, %s2904_s3 }
 0x418   : > { %p2907_p3 = pneg %p2906_p2  ;;  %p2913_p8 = por %p2912_p7, %p2911_p4 }
 0x41a   : > { %p2914_p9 = pnand %p2913_p8, %p2907_p3 }
 0x41c   : > { %2917 = shalt.err (!%p2914_p9)
}
 0x41d   : > { %s2918_s30 = scalar_lea.hbm %s3764_s21, 2048  ;;  %s2922_s26 = scalar_lea.hbm %s3959_s15, 4096 }
 0x41e   : > { %p2919_p10 = scmp.ne.s32.totalorder %s3764_s21, %s2918_s30  ;;  %p2923_p13 = scmp.lt.s32.totalorder %s3764_s21, %s3959_s15 }
 0x41f   : > { %p2924_p0 = scmp.lt.s32.totalorder %s2922_s26, %s2918_s30 }
 0x420   : > { %p2920_p11 = pnand %p2919_p10, %p3129_p5 }
 0x421   : > { %p2925_p1 = por %p2924_p0, %p2923_p13 }
 0x422   : > { %p2921_p12 = pneg %p2920_p11 }
 0x424   : > { %p2926_p2 = pnand %p2925_p1, %p2921_p12 }
 0x426   : > { %2929 = shalt.err (!%p2926_p2)
}
 0x427   : > { %2620 = dma.vmem_to_hbm [thread:$0]  (%p3129_p5), %s3791_s4, 2048, %s3764_s21, %s2136_s25, %s3002_s1, %s3002_s1, %s3003_s2  }
 0x428   : > { %v1803_v14 = vld [vmem:[%s3955_s11] sm:$0x3]  ;;  %s2369_s29 = sshll.u32 %s3500_s18, 8  ;;  %s2501_s2 = sshll.u32 %s3110_s22, 12 }
 0x429   : > { %v3821_v54 = vrot.slane %v1803_v14, %v3315_v4  ;;  %v3825_v55 = vrot.slane %v1803_v14, %v3313_v3  ;;  %s3829_s1 = scalar_lea.vmem [#allocation2], %s2369_s29  ;;  %s3896_s16 = scalar_lea.hbm %s3956_s12, %s2501_s2 }
 0x42a   : > { %s2150_s21 = sshll.u32 %s3829_s1, 4  ;;  %s2121_s22 = scalar_lea.sflag [#allocation3], %s3500_s18  ;;  %s3898_s21 = int_to_ptr.vmem [resolvable:$true] %s2150_s21 }
 0x42b   : > { %s2930_s27 = scalar_lea.vmem %s3898_s21, 4096  ;;  %s3006_s30 = smov [#allocation2]  }
 0x42c   : > { %p2931_p3 = scmp.ne.s32.totalorder %s3898_s21, %s2930_s27  ;;  %s2934_s20 = sshll.u32 %s3006_s30, 4  ;;  %s2935_s20 = int_to_ptr.vmem [resolvable:$false] %s2934_s20 }
 0x42d   : > { %s2936_s24 = scalar_lea.vmem %s2935_s20, 8192  ;;  %p2937_p8 = scmp.lt.s32.totalorder %s3898_s21, %s2935_s20 }
 0x42e   : > { %p2932_p4 = pnand %p2931_p3, %p3129_p5  ;;  %p2938_p9 = scmp.lt.s32.totalorder %s2936_s24, %s2930_s27 }
 0x430   : > { %p2933_p7 = pneg %p2932_p4  ;;  %p2939_p10 = por %p2938_p9, %p2937_p8 }
 0x432   : > { %p2940_p11 = pnand %p2939_p10, %p2933_p7 }
 0x475   : > { %v1929_v38 = vpop.f32.mrf.mxu0 }
 0x476   : > { %v1930_v57 = vadd.f32 %v1929_v38, %v3821_v54 }
 0x477   : > { %v1931_v58 = vpop.f32.mrf.mxu0 }
 0x478   : > { %v2008_v59 = vmax.f32 %v1930_v57, 0.0  ;;  %v1932_v60 = vadd.f32 %v1931_v58, %v3825_v55 }
 0x479   : > { %v1933_v61 = vpop.f32.mrf.mxu0 }
 0x47a   : > { %2040 = vst [vmem:[%s3829_s1] sm:$0xff] %v2008_v59  ;;  %v2009_v4 = vmax.f32 %v1932_v60, 0.0  ;;  %v1934_v3 = vadd.f32 %v1933_v61, %v3821_v54 }
 0x47b   : > { %v1935_v47 = vpop.f32.mrf.mxu0 }
 0x47c   : > { %2041 = vst [vmem:[%s3829_s1 + $0x8] sm:$0xff] %v2009_v4  ;;  %v2010_v62 = vmax.f32 %v1934_v3, 0.0  ;;  %v1936_v63 = vadd.f32 %v1935_v47, %v3825_v55 }
 0x47d   : > { %v1939_v0 = vpop.f32.mrf.mxu0 }
 0x47e   : > { %2042 = vst [vmem:[%s3829_s1 + $0x10] sm:$0xff] %v2010_v62  ;;  %v2011_v5 = vmax.f32 %v1936_v63, 0.0  ;;  %v1940_v6 = vadd.f32 %v1939_v0, %v3821_v54 }
 0x47f   : > { %v1941_v10 = vpop.f32.mrf.mxu0 }
 0x480   : > { %2043 = vst [vmem:[%s3829_s1 + $0x18] sm:$0xff] %v2011_v5  ;;  %v2012_v11 = vmax.f32 %v1940_v6, 0.0  ;;  %v1942_v12 = vadd.f32 %v1941_v10, %v3825_v55 }
 0x481   : > { %v1943_v13 = vpop.f32.mrf.mxu0 }
 0x482   : > { %2044 = vst [vmem:[%s3829_s1 + $0x20] sm:$0xff] %v2012_v11  ;;  %v2013_v8 = vmax.f32 %v1942_v12, 0.0  ;;  %v1944_v56 = vadd.f32 %v1943_v13, %v3821_v54 }
 0x483   : > { %v1945_v7 = vpop.f32.mrf.mxu0 }
 0x484   : > { %2045 = vst [vmem:[%s3829_s1 + $0x28] sm:$0xff] %v2013_v8  ;;  %v2014_v15 = vmax.f32 %v1944_v56, 0.0  ;;  %v1946_v16 = vadd.f32 %v1945_v7, %v3825_v55 }
 0x485   : > { %v1949_v17 = vpop.f32.mrf.mxu0 }
 0x486   : > { %2046 = vst [vmem:[%s3829_s1 + $0x30] sm:$0xff] %v2014_v15  ;;  %v2015_v20 = vmax.f32 %v1946_v16, 0.0  ;;  %v1950_v21 = vadd.f32 %v1949_v17, %v3821_v54 }
 0x487   : > { %v1951_v22 = vpop.f32.mrf.mxu0 }
 0x488   : > { %2047 = vst [vmem:[%s3829_s1 + $0x38] sm:$0xff] %v2015_v20  ;;  %v2016_v23 = vmax.f32 %v1950_v21, 0.0  ;;  %v1952_v24 = vadd.f32 %v1951_v22, %v3825_v55 }
 0x489   : > { %v1953_v26 = vpop.f32.mrf.mxu0 }
 0x48a   : > { %2048 = vst [vmem:[%s3829_s1 + $0x40] sm:$0xff] %v2016_v23  ;;  %v2017_v9 = vmax.f32 %v1952_v24, 0.0  ;;  %v1954_v27 = vadd.f32 %v1953_v26, %v3821_v54 }
 0x48b   : > { %v1955_v28 = vpop.f32.mrf.mxu0 }
 0x48c   : > { %2049 = vst [vmem:[%s3829_s1 + $0x48] sm:$0xff] %v2017_v9  ;;  %v2018_v29 = vmax.f32 %v1954_v27, 0.0  ;;  %v1956_v30 = vadd.f32 %v1955_v28, %v3825_v55 }
 0x48d   : > { %v1959_v32 = vpop.f32.mrf.mxu0 }
 0x48e   : > { %2050 = vst [vmem:[%s3829_s1 + $0x50] sm:$0xff] %v2018_v29  ;;  %v2019_v33 = vmax.f32 %v1956_v30, 0.0  ;;  %v1960_v34 = vadd.f32 %v1959_v32, %v3821_v54 }
 0x48f   : > { %v1961_v35 = vpop.f32.mrf.mxu0 }
 0x490   : > { %2051 = vst [vmem:[%s3829_s1 + $0x58] sm:$0xff] %v2019_v33  ;;  %v2020_v1 = vmax.f32 %v1960_v34, 0.0  ;;  %v1962_v19 = vadd.f32 %v1961_v35, %v3825_v55 }
 0x491   : > { %v1963_v36 = vpop.f32.mrf.mxu0 }
 0x492   : > { %2052 = vst [vmem:[%s3829_s1 + $0x60] sm:$0xff] %v2020_v1  ;;  %v2021_v37 = vmax.f32 %v1962_v19, 0.0  ;;  %v1964_v39 = vadd.f32 %v1963_v36, %v3821_v54 }
 0x493   : > { %v1965_v2 = vpop.f32.mrf.mxu0 }
 0x494   : > { %2053 = vst [vmem:[%s3829_s1 + $0x68] sm:$0xff] %v2021_v37  ;;  %v2022_v40 = vmax.f32 %v1964_v39, 0.0  ;;  %v1966_v41 = vadd.f32 %v1965_v2, %v3825_v55 }
 0x495   : > { %v1969_v42 = vpop.f32.mrf.mxu0 }
 0x496   : > { %2054 = vst [vmem:[%s3829_s1 + $0x70] sm:$0xff] %v2022_v40  ;;  %v2023_v43 = vmax.f32 %v1966_v41, 0.0  ;;  %v1970_v25 = vadd.f32 %v1969_v42, %v3821_v54 }
 0x497   : > { %v1971_v44 = vpop.f32.mrf.mxu0 }
 0x498   : > { %2055 = vst [vmem:[%s3829_s1 + $0x78] sm:$0xff] %v2023_v43  ;;  %v2024_v45 = vmax.f32 %v1970_v25, 0.0  ;;  %v1972_v46 = vadd.f32 %v1971_v44, %v3825_v55 }
 0x499   : > { %v1973_v18 = vpop.f32.mrf.mxu0 }
 0x49a   : > { %2056 = vst [vmem:[%s3829_s1 + $0x80] sm:$0xff] %v2024_v45  ;;  %v2025_v48 = vmax.f32 %v1972_v46, 0.0  ;;  %v1974_v49 = vadd.f32 %v1973_v18, %v3821_v54 }
 0x49b   : > { %v1975_v31 = vpop.f32.mrf.mxu0 }
 0x49c   : > { %2057 = vst [vmem:[%s3829_s1 + $0x88] sm:$0xff] %v2025_v48  ;;  %v2026_v50 = vmax.f32 %v1974_v49, 0.0  ;;  %v1976_v51 = vadd.f32 %v1975_v31, %v3825_v55 }
 0x49d   : > { %v1979_v52 = vpop.f32.mrf.mxu0 }
 0x49e   : > { %2058 = vst [vmem:[%s3829_s1 + $0x90] sm:$0xff] %v2026_v50  ;;  %v2027_v53 = vmax.f32 %v1976_v51, 0.0  ;;  %v1980_v14 = vadd.f32 %v1979_v52, %v3821_v54 }
 0x49f   : > { %v1981_v38 = vpop.f32.mrf.mxu0 }
 0x4a0   : > { %2059 = vst [vmem:[%s3829_s1 + $0x98] sm:$0xff] %v2027_v53  ;;  %v2028_v57 = vmax.f32 %v1980_v14, 0.0  ;;  %v1982_v58 = vadd.f32 %v1981_v38, %v3825_v55 }
 0x4a1   : > { %v1983_v59 = vpop.f32.mrf.mxu0 }
 0x4a2   : > { %2060 = vst [vmem:[%s3829_s1 + $0xa0] sm:$0xff] %v2028_v57  ;;  %v2029_v60 = vmax.f32 %v1982_v58, 0.0  ;;  %v1984_v61 = vadd.f32 %v1983_v59, %v3821_v54 }
 0x4a3   : > { %v1985_v4 = vpop.f32.mrf.mxu0 }
 0x4a4   : > { %2061 = vst [vmem:[%s3829_s1 + $0xa8] sm:$0xff] %v2029_v60  ;;  %v2030_v3 = vmax.f32 %v1984_v61, 0.0  ;;  %v1986_v47 = vadd.f32 %v1985_v4, %v3825_v55 }
 0x4a5   : > { %v1989_v62 = vpop.f32.mrf.mxu0 }
 0x4a6   : > { %2062 = vst [vmem:[%s3829_s1 + $0xb0] sm:$0xff] %v2030_v3  ;;  %v2031_v63 = vmax.f32 %v1986_v47, 0.0  ;;  %v1990_v0 = vadd.f32 %v1989_v62, %v3821_v54 }
 0x4a7   : > { %v1991_v5 = vpop.f32.mrf.mxu0 }
 0x4a8   : > { %2063 = vst [vmem:[%s3829_s1 + $0xb8] sm:$0xff] %v2031_v63  ;;  %v2032_v6 = vmax.f32 %v1990_v0, 0.0  ;;  %v1992_v10 = vadd.f32 %v1991_v5, %v3825_v55 }
 0x4a9   : > { %v1993_v11 = vpop.f32.mrf.mxu0 }
 0x4aa   : > { %2064 = vst [vmem:[%s3829_s1 + $0xc0] sm:$0xff] %v2032_v6  ;;  %v2033_v12 = vmax.f32 %v1992_v10, 0.0  ;;  %v1994_v13 = vadd.f32 %v1993_v11, %v3821_v54 }
 0x4ab   : > { %v1995_v8 = vpop.f32.mrf.mxu0 }
 0x4ac   : > { %2065 = vst [vmem:[%s3829_s1 + $0xc8] sm:$0xff] %v2033_v12  ;;  %v2034_v56 = vmax.f32 %v1994_v13, 0.0  ;;  %v1996_v7 = vadd.f32 %v1995_v8, %v3825_v55 }
 0x4ad   : > { %v1999_v15 = vpop.f32.mrf.mxu0 }
 0x4ae   : > { %2066 = vst [vmem:[%s3829_s1 + $0xd0] sm:$0xff] %v2034_v56  ;;  %v2035_v16 = vmax.f32 %v1996_v7, 0.0  ;;  %v2000_v17 = vadd.f32 %v1999_v15, %v3821_v54 }
 0x4af   : > { %v2001_v20 = vpop.f32.mrf.mxu0 }
 0x4b0   : > { %2067 = vst [vmem:[%s3829_s1 + $0xd8] sm:$0xff] %v2035_v16  ;;  %v2036_v21 = vmax.f32 %v2000_v17, 0.0  ;;  %v2002_v22 = vadd.f32 %v2001_v20, %v3825_v55 }
 0x4b1   : > { %v2003_v23 = vpop.f32.mrf.mxu0 }
 0x4b2   : > { %2068 = vst [vmem:[%s3829_s1 + $0xe0] sm:$0xff] %v2036_v21  ;;  %v2037_v24 = vmax.f32 %v2002_v22, 0.0  ;;  %v2004_v26 = vadd.f32 %v2003_v23, %v3821_v54 }
 0x4b3   : > { %v2005_v9 = vpop.f32.mrf.mxu0 }
 0x4b4   : > { %2069 = vst [vmem:[%s3829_s1 + $0xe8] sm:$0xff] %v2037_v24  ;;  %v2038_v27 = vmax.f32 %v2004_v26, 0.0  ;;  %v2006_v28 = vadd.f32 %v2005_v9, %v3825_v55 }
 0x4b6   : > { %2070 = vst [vmem:[%s3829_s1 + $0xf0] sm:$0xff] %v2038_v27  ;;  %v2039_v29 = vmax.f32 %v2006_v28, 0.0 }
 0x4b8   : > { %2071 = vst [vmem:[%s3829_s1 + $0xf8] sm:$0xff] %v2039_v29 }
 0x4b9   : > { %2943 = shalt.err (!%p2940_p11)
}
 0x4ba   : > { %s2944_s26 = scalar_lea.hbm %s3896_s16, 4096  ;;  %s2948_s17 = scalar_lea.hbm %s3956_s12, 8192 }
 0x4bb   : > { %p2945_p12 = scmp.ne.s32.totalorder %s3896_s16, %s2944_s26  ;;  %p2949_p1 = scmp.lt.s32.totalorder %s3896_s16, %s3956_s12 }
 0x4bc   : > { %p2950_p2 = scmp.lt.s32.totalorder %s2948_s17, %s2944_s26 }
 0x4bd   : > { %p2946_p13 = pnand %p2945_p12, %p3129_p5 }
 0x4be   : > { %p2951_p3 = por %p2950_p2, %p2949_p1 }
 0x4bf   : > { %p2947_p0 = pneg %p2946_p13 }
 0x4c1   : > { %p2952_p4 = pnand %p2951_p3, %p2947_p0 }
 0x4c3   : > { %2955 = shalt.err (!%p2952_p4)
}
 0x4c4   : > { %s3007_s1 = smov 256   ;;  %s3008_s2 = smov 16  }
 0x4c5   : > { %2617 = dma.vmem_to_hbm [thread:$0]  (%p3129_p5), %s3898_s21, 4096, %s3896_s16, %s2121_s22, %s3007_s1, %s3007_s1, %s3008_s2  }
 0x4c6 PF: > { %s3988_s4 = sld [smem:[#allocation14_spill]] }
 0x4c7   : > { %s3989_s25 = sld [smem:[#allocation12_spill]] }
 0x4cc   : > { %p2638_p7 = scmp.ge.s32.totalorder %s3988_s4, 2 }
 0x4cd   : > { %s2213_s30 = sand.u32 1, %s3989_s25  }
 0x4ce   : > { %p2626_p8 = pnand %p2638_p7, %p3133_p6  ;;  %s2214_s20 = scalar_lea.sflag [#allocation3], %s2213_s30 }
 0x4d0   : > { %p2627_p9 = pneg %p2626_p8 }
 0x4d2   : > { %2973 = dma.done.wait (%p2627_p9), %s2214_s20, 4096  }
 0x4d3   : > { %2975 = vsyncadd (%p2627_p9), %s2214_s20, 4294963200  ;;  %s3991_s24 = sadd.s32 4294967294, %s3988_s4  }
 0x4d4   : > { %s2222_s26 = sand.u32 1, %s3991_s24  }
 0x4d5   : > { %s2223_s23 = scalar_lea.sflag [#allocation5], %s2222_s26 }
 0x4d6   : > { %2977 = dma.done.wait (%p2627_p9), %s2223_s23, 4096  }
 0x4d7   : > { %2979 = vsyncadd (%p2627_p9), %s2223_s23, 4294963200  ;;  %s2241_s28 = scalar_lea.sflag [#allocation8], %s2213_s30 }
 0x4d8   : > { %2981 = dma.done.wait (%p2627_p9), %s2241_s28, 2048  }
 0x4d9   : > { %2983 = vsyncadd (%p2627_p9), %s2241_s28, 4294965248  ;;  %s3992_s21 = sld [smem:[#allocation15_spill]]  ;;  %s3995_s18 = smov %s2990_s19 }
 0x4da   : > { %s3993_s16 = sld [smem:[#allocation13_spill]] }
 0x4db   : > { %s3994_s20 = sld [smem:[#allocation16_spill]] }
 0x4df   : > { %p32_p5 = scmp.ge.s32.totalorder %s3992_s21, 4  }
 0x4e0   : > { %s3996_s19 = smov %s3993_s16 }
 0x4e1   :  { %34 = sbr.rel (!%p32_p5) target bundleno = 13 (0xd), region = 155 }
 0x4e6   :  { %2246 = vsyncpa [#allocation3], 1 }
 0x4e7   :  { %2248 = vsyncpa [#allocation3 + $0x1], 1 }
 0x4e8   :  { %2249 = vsyncpa [#allocation5], 1 }
 0x4e9   :  { %2251 = vsyncpa [#allocation5 + $0x1], 1 }
 0x4ea   :  { %2252 = vsyncpa [#allocation8], 1 }
 0x4eb   :  { %2254 = vsyncpa [#allocation8 + $0x1], 1 }

</bundles_post_ra>
